<compile_context>
chip_gen: v5e
topology: v5e:2x2
jax: 0.10.0
libtpu: 0.0.40
codegen_flags: <defaults>
</compile_context>

<pallas_src>
import functools

import jax
import jax.numpy as jnp
from jax.experimental import pallas as pl
from jax.experimental.pallas import tpu as pltpu


_PACK = 8  # batch rows folded into one packed row (8 * latent16 = 128 lanes)


def _round_up(n, m):
    return ((n + m - 1) // m) * m


def encoder_kernel(x_ref, w0_ref, b0_ref, w1_ref, b1_ref, w2_ref, b2_ref,
                   w3_ref, b3_ref, o_ref, *, in_dim, latent_dim, pack):
    """Fused 4-layer MLP on one packed batch tile.

    x_ref: (tpb, pack*in_dim)      -- pack original rows per packed row
    o_ref: (tpb, pack*latent_dim)  -- lane-dense packed output
    """
    layers = ((w0_ref, b0_ref), (w1_ref, b1_ref),
              (w2_ref, b2_ref), (w3_ref, b3_ref))
    for j in range(pack):                       # static unroll: 8 chains
        # Aligned lane slice of the input block (offsets are multiples of 128).
        h = x_ref[:, j * in_dim:(j + 1) * in_dim]
        for w_ref, b_ref in layers:
            y = jnp.dot(h.astype(w_ref.dtype), w_ref[...],
                        preferred_element_type=jnp.float32)
            h = jnp.maximum(y + b_ref[...], 0.0)       # bias (f32) + ReLU
        o_ref[:, j * latent_dim:(j + 1) * latent_dim] = h.astype(o_ref.dtype)


def _pad_and_cast_params(params, in_dim, compute_dtype):
    """Zero-pad ragged hidden dims (14, 12 -> 16); cast weights for the MXU."""
    dims = [in_dim] + [w.shape[1] for (w, _) in params]
    pdims = [dims[0]] + [_round_up(d, 8) for d in dims[1:-1]] + [dims[-1]]
    out = []
    for i, (w, b) in enumerate(params):
        pin, pout = pdims[i], pdims[i + 1]
        wp = jnp.zeros((pin, pout), compute_dtype)
        wp = wp.at[:w.shape[0], :w.shape[1]].set(w.astype(compute_dtype))
        b2d = b.reshape(1, -1).astype(jnp.float32)
        bp = jnp.zeros((1, pout), jnp.float32).at[:, :b2d.shape[1]].set(b2d)
        out.append((wp, bp))
    return out


def encoder_forward(x, params, *, block_batch=4096, input_buffer_count=2):
    """Encoder forward.  x: (B, H, W) or (B, flat); params: [(W(in,out), b)].

    Pass x in bf16 to halve HBM traffic (the kernel streams x at its own
    dtype); weights are cast to match, accumulation stays f32.
    """
    B = x.shape[0]
    x_flat = x.reshape(B, -1)                    # x.view(x.size(0), -1)
    in_dim = x_flat.shape[1]
    latent_dim = params[-1][0].shape[1]
    compute_dtype = x_flat.dtype

    # Pad the batch only to a multiple of the pack factor (8). In the common
    # B % 8 == 0 case this is a no-op -> no extra HBM pass over x.
    padded_b = _round_up(max(B, _PACK), _PACK)
    if padded_b != B:
        x_flat = jnp.pad(x_flat, ((0, padded_b - B), (0, 0)))
    bp_rows = padded_b // _PACK

    # Lane-dense pack: (padded_b, in_dim) -> (padded_b/8, 8*in_dim).
    # Contiguous row-major reshape => metadata-only (bitcast), no HBM copy.
    xp = x_flat.reshape(bp_rows, _PACK * in_dim)

    # Packed-row tile: multiple of 8 sublanes, capped at block_batch original
    # rows per step, and split so the grid has >=2 steps when possible
    # (v7x megacore via dimension_semantics=("parallel",)).
    max_tpb = max(8, block_batch // _PACK)
    if bp_rows <= 8:
        tpb = bp_rows                            # single full-array block
    else:
        tpb = min(max_tpb, max(8, _round_up(pl.cdiv(bp_rows, 2), 8)))
    grid = (pl.cdiv(bp_rows, tpb),)              # ragged last block is masked

    pparams = _pad_and_cast_params(params, in_dim, compute_dtype)

    x_spec_kwargs = {}
    if input_buffer_count != 2:                  # optional deeper pipeline (v7x)
        x_spec_kwargs["pipeline_mode"] = pl.Buffered(input_buffer_count)

    flat_args = [xp]
    in_specs = [pl.BlockSpec((tpb, _PACK * in_dim), lambda i: (i, 0),
                             **x_spec_kwargs)]
    for w, b in pparams:                         # VMEM-resident tiny params
        flat_args.extend([w, b])
        in_specs.append(pl.BlockSpec(w.shape, lambda i: (0, 0)))
        in_specs.append(pl.BlockSpec(b.shape, lambda i: (0, 0)))
    out_specs = pl.BlockSpec((tpb, _PACK * latent_dim), lambda i: (i, 0))

    kernel = functools.partial(encoder_kernel, in_dim=in_dim,
                               latent_dim=latent_dim, pack=_PACK)

    itemsize = x_flat.dtype.itemsize
    x_block_bytes = tpb * _PACK * in_dim * itemsize
    o_block_bytes = tpb * _PACK * latent_dim * itemsize
    param_bytes = sum(w.size * w.dtype.itemsize + b.size * 4 for w, b in pparams)
    # Explicit scoped-VMEM limit: >=32 MiB (above v5e's 16 MiB default) but
    # capped at 48 MiB so it stays comfortably inside v7x's 64 MiB physical.
    vmem_limit = int(min(48 * 2**20,
                         max(32 * 2**20,
                             3 * (x_block_bytes + o_block_bytes)
                             + 2 * param_bytes + (1 << 20))))

    flops = 2 * padded_b * sum(w.shape[0] * w.shape[1] for w, _ in pparams)
    bytes_accessed = (padded_b * (in_dim + latent_dim) * itemsize + param_bytes)

    out = pl.pallas_call(
        kernel,
        out_shape=jax.ShapeDtypeStruct((bp_rows, _PACK * latent_dim),
                                       compute_dtype),
        grid=grid,
        in_specs=in_specs,
        out_specs=out_specs,
        compiler_params=pltpu.CompilerParams(
            dimension_semantics=("parallel",),
            vmem_limit_bytes=vmem_limit),
        cost_estimate=pl.CostEstimate(flops=flops, transcendentals=0,
                                      bytes_accessed=bytes_accessed),
    )(*flat_args)

    out = out.reshape(padded_b, latent_dim)      # free un-pack (row-major)
    return out[:B] if padded_b != B else out


def init_params(key, flat_input_size, hidden_layer_size, latent_dim):
    """Deterministic init mirroring the layer shapes of the PyTorch module."""
    sizes = [flat_input_size] + list(hidden_layer_size) + [latent_dim]
    params = []
    for i in range(len(sizes) - 1):
        key, kw, kb = jax.random.split(key, 3)
        fan_in, fan_out = sizes[i], sizes[i + 1]
        bound = 1.0 / jnp.sqrt(fan_in)
        w = jax.random.uniform(kw, (fan_in, fan_out), jnp.float32, -bound, bound)
        b = jax.random.uniform(kb, (1, fan_out), jnp.float32, -bound, bound)
        params.append((w, b))
    return params


def reference_forward(x, params):
    """Plain-JAX reference for sanity checking."""
    h = x.reshape(x.shape[0], -1).astype(jnp.float32)
    for w, b in params:
        h = jnp.maximum(h @ w + b, 0.0)
    return h


if __name__ == "__main__":
    key = jax.random.PRNGKey(0)
    k_x1, k_x2, k_x3, k_p = jax.random.split(key, 4)

    input_size = (16, 16)            # -> flat_input_size = 256
    hidden_layer_size = [16, 14, 12]
    latent_dim = 16
    params = init_params(k_p, input_size[0] * input_size[1],
                         hidden_layer_size, latent_dim)

    fwd = jax.jit(functools.partial(encoder_forward, block_batch=4096))

    # 1) Small f32 batch (single packed block).
    x1 = jax.random.normal(k_x1, (16, *input_size), jnp.float32)
    out1 = jax.block_until_ready(fwd(x1, params))
    assert out1.shape == (16, latent_dim)
    assert jnp.allclose(out1, reference_forward(x1, params), atol=1e-5, rtol=1e-5)

    # 2) Larger ragged f32 batch: multi-step grid + masked partial last block.
    x2 = jax.random.normal(k_x2, (1000, *input_size), jnp.float32)
    out2 = jax.block_until_ready(fwd(x2, params))
    assert out2.shape == (1000, latent_dim)
    assert jnp.allclose(out2, reference_forward(x2, params), atol=1e-5, rtol=1e-5)

    # 3) bf16 streaming path (input supplied in bf16; weights cast to bf16,
    #    f32 accumulation). Looser tolerance vs the f32 reference.
    x3 = jax.random.normal(k_x3, (256, *input_size), jnp.float32).astype(jnp.bfloat16)
    out3 = jax.block_until_ready(fwd(x3, params))
    assert out3.shape == (256, latent_dim)
    ref3 = reference_forward(x3.astype(jnp.float32), params)
    assert jnp.allclose(out3.astype(jnp.float32), ref3, atol=5e-2, rtol=5e-2)

    print("KERNEL_OK")
</pallas_src>

<mosaic_0001>
module attributes {stable_mosaic.version = 11 : i64} {
  func.func @encoder_kernel(%arg0: i32, %arg1: memref<2x2048xf32, #tpu.memory_space<vmem>>, %arg2: memref<256x16xf32, #tpu.memory_space<vmem>>, %arg3: memref<1x16xf32, #tpu.memory_space<vmem>>, %arg4: memref<16x16xf32, #tpu.memory_space<vmem>>, %arg5: memref<1x16xf32, #tpu.memory_space<vmem>>, %arg6: memref<16x16xf32, #tpu.memory_space<vmem>>, %arg7: memref<1x16xf32, #tpu.memory_space<vmem>>, %arg8: memref<16x16xf32, #tpu.memory_space<vmem>>, %arg9: memref<1x16xf32, #tpu.memory_space<vmem>>, %arg10: memref<2x128xf32, #tpu.memory_space<vmem>>) attributes {dimension_semantics = [#tpu.dimension_semantics<parallel>], iteration_bounds = array<i64: 1>, scalar_prefetch = 0 : i64, scratch_operands = 0 : i64, tpu.core_type = #tpu.core_type<tc>, window_params = [{transform_indices = @transform_0, window_bounds = array<i64: 2, 2048>}, {pipeline_mode = #tpu.pipeline_mode<synchronous>, transform_indices = @transform_1, window_bounds = array<i64: 256, 16>}, {pipeline_mode = #tpu.pipeline_mode<synchronous>, transform_indices = @transform_2, window_bounds = array<i64: 1, 16>}, {pipeline_mode = #tpu.pipeline_mode<synchronous>, transform_indices = @transform_3, window_bounds = array<i64: 16, 16>}, {pipeline_mode = #tpu.pipeline_mode<synchronous>, transform_indices = @transform_4, window_bounds = array<i64: 1, 16>}, {pipeline_mode = #tpu.pipeline_mode<synchronous>, transform_indices = @transform_5, window_bounds = array<i64: 16, 16>}, {pipeline_mode = #tpu.pipeline_mode<synchronous>, transform_indices = @transform_6, window_bounds = array<i64: 1, 16>}, {pipeline_mode = #tpu.pipeline_mode<synchronous>, transform_indices = @transform_7, window_bounds = array<i64: 16, 16>}, {pipeline_mode = #tpu.pipeline_mode<synchronous>, transform_indices = @transform_8, window_bounds = array<i64: 1, 16>}, {transform_indices = @transform_9, window_bounds = array<i64: 2, 128>}]} {
    %c0 = arith.constant 0 : index
    %c0_0 = arith.constant 0 : index
    %0 = vector.load %arg1[%c0, %c0_0] : memref<2x2048xf32, #tpu.memory_space<vmem>>, vector<2x256xf32>
    %c0_1 = arith.constant 0 : index
    %c0_2 = arith.constant 0 : index
    %1 = vector.load %arg2[%c0_1, %c0_2] : memref<256x16xf32, #tpu.memory_space<vmem>>, vector<256x16xf32>
    %cst = arith.constant dense<0.000000e+00> : vector<2x16xf32>
    %2 = tpu.matmul %0, %1, %cst {dimension_numbers = #tpu.dot_dimension_numbers<[1], [0], [0], [1], [0, 0, 1, 1], [], []>} : vector<2x256xf32>, vector<256x16xf32>, vector<2x16xf32> -> vector<2x16xf32>
    %c0_3 = arith.constant 0 : index
    %c0_4 = arith.constant 0 : index
    %3 = vector.load %arg3[%c0_3, %c0_4] : memref<1x16xf32, #tpu.memory_space<vmem>>, vector<1x16xf32>
    %4 = vector.broadcast %3 : vector<1x16xf32> to vector<2x16xf32>
    %5 = arith.addf %2, %4 : vector<2x16xf32>
    %cst_5 = arith.constant 0.000000e+00 : f32
    %6 = vector.broadcast %cst_5 : f32 to vector<2x16xf32>
    %7 = arith.maximumf %5, %6 : vector<2x16xf32>
    %c0_6 = arith.constant 0 : index
    %c0_7 = arith.constant 0 : index
    %8 = vector.load %arg4[%c0_6, %c0_7] : memref<16x16xf32, #tpu.memory_space<vmem>>, vector<16x16xf32>
    %cst_8 = arith.constant dense<0.000000e+00> : vector<2x16xf32>
    %9 = tpu.matmul %7, %8, %cst_8 {dimension_numbers = #tpu.dot_dimension_numbers<[1], [0], [0], [1], [0, 0, 1, 1], [], []>} : vector<2x16xf32>, vector<16x16xf32>, vector<2x16xf32> -> vector<2x16xf32>
    %c0_9 = arith.constant 0 : index
    %c0_10 = arith.constant 0 : index
    %10 = vector.load %arg5[%c0_9, %c0_10] : memref<1x16xf32, #tpu.memory_space<vmem>>, vector<1x16xf32>
    %11 = vector.broadcast %10 : vector<1x16xf32> to vector<2x16xf32>
    %12 = arith.addf %9, %11 : vector<2x16xf32>
    %cst_11 = arith.constant 0.000000e+00 : f32
    %13 = vector.broadcast %cst_11 : f32 to vector<2x16xf32>
    %14 = arith.maximumf %12, %13 : vector<2x16xf32>
    %c0_12 = arith.constant 0 : index
    %c0_13 = arith.constant 0 : index
    %15 = vector.load %arg6[%c0_12, %c0_13] : memref<16x16xf32, #tpu.memory_space<vmem>>, vector<16x16xf32>
    %cst_14 = arith.constant dense<0.000000e+00> : vector<2x16xf32>
    %16 = tpu.matmul %14, %15, %cst_14 {dimension_numbers = #tpu.dot_dimension_numbers<[1], [0], [0], [1], [0, 0, 1, 1], [], []>} : vector<2x16xf32>, vector<16x16xf32>, vector<2x16xf32> -> vector<2x16xf32>
    %c0_15 = arith.constant 0 : index
    %c0_16 = arith.constant 0 : index
    %17 = vector.load %arg7[%c0_15, %c0_16] : memref<1x16xf32, #tpu.memory_space<vmem>>, vector<1x16xf32>
    %18 = vector.broadcast %17 : vector<1x16xf32> to vector<2x16xf32>
    %19 = arith.addf %16, %18 : vector<2x16xf32>
    %cst_17 = arith.constant 0.000000e+00 : f32
    %20 = vector.broadcast %cst_17 : f32 to vector<2x16xf32>
    %21 = arith.maximumf %19, %20 : vector<2x16xf32>
    %c0_18 = arith.constant 0 : index
    %c0_19 = arith.constant 0 : index
    %22 = vector.load %arg8[%c0_18, %c0_19] : memref<16x16xf32, #tpu.memory_space<vmem>>, vector<16x16xf32>
    %cst_20 = arith.constant dense<0.000000e+00> : vector<2x16xf32>
    %23 = tpu.matmul %21, %22, %cst_20 {dimension_numbers = #tpu.dot_dimension_numbers<[1], [0], [0], [1], [0, 0, 1, 1], [], []>} : vector<2x16xf32>, vector<16x16xf32>, vector<2x16xf32> -> vector<2x16xf32>
    %c0_21 = arith.constant 0 : index
    %c0_22 = arith.constant 0 : index
    %24 = vector.load %arg9[%c0_21, %c0_22] : memref<1x16xf32, #tpu.memory_space<vmem>>, vector<1x16xf32>
    %25 = vector.broadcast %24 : vector<1x16xf32> to vector<2x16xf32>
    %26 = arith.addf %23, %25 : vector<2x16xf32>
    %cst_23 = arith.constant 0.000000e+00 : f32
    %27 = vector.broadcast %cst_23 : f32 to vector<2x16xf32>
    %28 = arith.maximumf %26, %27 : vector<2x16xf32>
    %c0_24 = arith.constant 0 : index
    %c0_25 = arith.constant 0 : index
    %29 = vector.load %arg10[%c0_24, %c0_25] : memref<2x128xf32, #tpu.memory_space<vmem>>, vector<2x16xf32>
    tpu.vector_store %arg10[%c0_24, %c0_25], %28 {strides = array<i32>} : memref<2x128xf32, #tpu.memory_space<vmem>>, vector<2x16xf32>,
    %c0_26 = arith.constant 0 : index
    %c256 = arith.constant 256 : index
    %30 = vector.load %arg1[%c0_26, %c256] : memref<2x2048xf32, #tpu.memory_space<vmem>>, vector<2x256xf32>
    %c0_27 = arith.constant 0 : index
    %c0_28 = arith.constant 0 : index
    %31 = vector.load %arg2[%c0_27, %c0_28] : memref<256x16xf32, #tpu.memory_space<vmem>>, vector<256x16xf32>
    %cst_29 = arith.constant dense<0.000000e+00> : vector<2x16xf32>
    %32 = tpu.matmul %30, %31, %cst_29 {dimension_numbers = #tpu.dot_dimension_numbers<[1], [0], [0], [1], [0, 0, 1, 1], [], []>} : vector<2x256xf32>, vector<256x16xf32>, vector<2x16xf32> -> vector<2x16xf32>
    %c0_30 = arith.constant 0 : index
    %c0_31 = arith.constant 0 : index
    %33 = vector.load %arg3[%c0_30, %c0_31] : memref<1x16xf32, #tpu.memory_space<vmem>>, vector<1x16xf32>
    %34 = vector.broadcast %33 : vector<1x16xf32> to vector<2x16xf32>
    %35 = arith.addf %32, %34 : vector<2x16xf32>
    %cst_32 = arith.constant 0.000000e+00 : f32
    %36 = vector.broadcast %cst_32 : f32 to vector<2x16xf32>
    %37 = arith.maximumf %35, %36 : vector<2x16xf32>
    %c0_33 = arith.constant 0 : index
    %c0_34 = arith.constant 0 : index
    %38 = vector.load %arg4[%c0_33, %c0_34] : memref<16x16xf32, #tpu.memory_space<vmem>>, vector<16x16xf32>
    %cst_35 = arith.constant dense<0.000000e+00> : vector<2x16xf32>
    %39 = tpu.matmul %37, %38, %cst_35 {dimension_numbers = #tpu.dot_dimension_numbers<[1], [0], [0], [1], [0, 0, 1, 1], [], []>} : vector<2x16xf32>, vector<16x16xf32>, vector<2x16xf32> -> vector<2x16xf32>
    %c0_36 = arith.constant 0 : index
    %c0_37 = arith.constant 0 : index
    %40 = vector.load %arg5[%c0_36, %c0_37] : memref<1x16xf32, #tpu.memory_space<vmem>>, vector<1x16xf32>
    %41 = vector.broadcast %40 : vector<1x16xf32> to vector<2x16xf32>
    %42 = arith.addf %39, %41 : vector<2x16xf32>
    %cst_38 = arith.constant 0.000000e+00 : f32
    %43 = vector.broadcast %cst_38 : f32 to vector<2x16xf32>
    %44 = arith.maximumf %42, %43 : vector<2x16xf32>
    %c0_39 = arith.constant 0 : index
    %c0_40 = arith.constant 0 : index
    %45 = vector.load %arg6[%c0_39, %c0_40] : memref<16x16xf32, #tpu.memory_space<vmem>>, vector<16x16xf32>
    %cst_41 = arith.constant dense<0.000000e+00> : vector<2x16xf32>
    %46 = tpu.matmul %44, %45, %cst_41 {dimension_numbers = #tpu.dot_dimension_numbers<[1], [0], [0], [1], [0, 0, 1, 1], [], []>} : vector<2x16xf32>, vector<16x16xf32>, vector<2x16xf32> -> vector<2x16xf32>
    %c0_42 = arith.constant 0 : index
    %c0_43 = arith.constant 0 : index
    %47 = vector.load %arg7[%c0_42, %c0_43] : memref<1x16xf32, #tpu.memory_space<vmem>>, vector<1x16xf32>
    %48 = vector.broadcast %47 : vector<1x16xf32> to vector<2x16xf32>
    %49 = arith.addf %46, %48 : vector<2x16xf32>
    %cst_44 = arith.constant 0.000000e+00 : f32
    %50 = vector.broadcast %cst_44 : f32 to vector<2x16xf32>
    %51 = arith.maximumf %49, %50 : vector<2x16xf32>
    %c0_45 = arith.constant 0 : index
    %c0_46 = arith.constant 0 : index
    %52 = vector.load %arg8[%c0_45, %c0_46] : memref<16x16xf32, #tpu.memory_space<vmem>>, vector<16x16xf32>
    %cst_47 = arith.constant dense<0.000000e+00> : vector<2x16xf32>
    %53 = tpu.matmul %51, %52, %cst_47 {dimension_numbers = #tpu.dot_dimension_numbers<[1], [0], [0], [1], [0, 0, 1, 1], [], []>} : vector<2x16xf32>, vector<16x16xf32>, vector<2x16xf32> -> vector<2x16xf32>
    %c0_48 = arith.constant 0 : index
    %c0_49 = arith.constant 0 : index
    %54 = vector.load %arg9[%c0_48, %c0_49] : memref<1x16xf32, #tpu.memory_space<vmem>>, vector<1x16xf32>
    %55 = vector.broadcast %54 : vector<1x16xf32> to vector<2x16xf32>
    %56 = arith.addf %53, %55 : vector<2x16xf32>
    %cst_50 = arith.constant 0.000000e+00 : f32
    %57 = vector.broadcast %cst_50 : f32 to vector<2x16xf32>
    %58 = arith.maximumf %56, %57 : vector<2x16xf32>
    %c0_51 = arith.constant 0 : index
    %c16 = arith.constant 16 : index
    %59 = vector.load %arg10[%c0_51, %c16] : memref<2x128xf32, #tpu.memory_space<vmem>>, vector<2x16xf32>
    tpu.vector_store %arg10[%c0_51, %c16], %58 {strides = array<i32>} : memref<2x128xf32, #tpu.memory_space<vmem>>, vector<2x16xf32>,
    %c0_52 = arith.constant 0 : index
    %c512 = arith.constant 512 : index
    %60 = vector.load %arg1[%c0_52, %c512] : memref<2x2048xf32, #tpu.memory_space<vmem>>, vector<2x256xf32>
    %c0_53 = arith.constant 0 : index
    %c0_54 = arith.constant 0 : index
    %61 = vector.load %arg2[%c0_53, %c0_54] : memref<256x16xf32, #tpu.memory_space<vmem>>, vector<256x16xf32>
    %cst_55 = arith.constant dense<0.000000e+00> : vector<2x16xf32>
    %62 = tpu.matmul %60, %61, %cst_55 {dimension_numbers = #tpu.dot_dimension_numbers<[1], [0], [0], [1], [0, 0, 1, 1], [], []>} : vector<2x256xf32>, vector<256x16xf32>, vector<2x16xf32> -> vector<2x16xf32>
    %c0_56 = arith.constant 0 : index
    %c0_57 = arith.constant 0 : index
    %63 = vector.load %arg3[%c0_56, %c0_57] : memref<1x16xf32, #tpu.memory_space<vmem>>, vector<1x16xf32>
    %64 = vector.broadcast %63 : vector<1x16xf32> to vector<2x16xf32>
    %65 = arith.addf %62, %64 : vector<2x16xf32>
    %cst_58 = arith.constant 0.000000e+00 : f32
    %66 = vector.broadcast %cst_58 : f32 to vector<2x16xf32>
    %67 = arith.maximumf %65, %66 : vector<2x16xf32>
    %c0_59 = arith.constant 0 : index
    %c0_60 = arith.constant 0 : index
    %68 = vector.load %arg4[%c0_59, %c0_60] : memref<16x16xf32, #tpu.memory_space<vmem>>, vector<16x16xf32>
    %cst_61 = arith.constant dense<0.000000e+00> : vector<2x16xf32>
    %69 = tpu.matmul %67, %68, %cst_61 {dimension_numbers = #tpu.dot_dimension_numbers<[1], [0], [0], [1], [0, 0, 1, 1], [], []>} : vector<2x16xf32>, vector<16x16xf32>, vector<2x16xf32> -> vector<2x16xf32>
    %c0_62 = arith.constant 0 : index
    %c0_63 = arith.constant 0 : index
    %70 = vector.load %arg5[%c0_62, %c0_63] : memref<1x16xf32, #tpu.memory_space<vmem>>, vector<1x16xf32>
    %71 = vector.broadcast %70 : vector<1x16xf32> to vector<2x16xf32>
    %72 = arith.addf %69, %71 : vector<2x16xf32>
    %cst_64 = arith.constant 0.000000e+00 : f32
    %73 = vector.broadcast %cst_64 : f32 to vector<2x16xf32>
    %74 = arith.maximumf %72, %73 : vector<2x16xf32>
    %c0_65 = arith.constant 0 : index
    %c0_66 = arith.constant 0 : index
    %75 = vector.load %arg6[%c0_65, %c0_66] : memref<16x16xf32, #tpu.memory_space<vmem>>, vector<16x16xf32>
    %cst_67 = arith.constant dense<0.000000e+00> : vector<2x16xf32>
    %76 = tpu.matmul %74, %75, %cst_67 {dimension_numbers = #tpu.dot_dimension_numbers<[1], [0], [0], [1], [0, 0, 1, 1], [], []>} : vector<2x16xf32>, vector<16x16xf32>, vector<2x16xf32> -> vector<2x16xf32>
    %c0_68 = arith.constant 0 : index
    %c0_69 = arith.constant 0 : index
    %77 = vector.load %arg7[%c0_68, %c0_69] : memref<1x16xf32, #tpu.memory_space<vmem>>, vector<1x16xf32>
    %78 = vector.broadcast %77 : vector<1x16xf32> to vector<2x16xf32>
    %79 = arith.addf %76, %78 : vector<2x16xf32>
    %cst_70 = arith.constant 0.000000e+00 : f32
    %80 = vector.broadcast %cst_70 : f32 to vector<2x16xf32>
    %81 = arith.maximumf %79, %80 : vector<2x16xf32>
    %c0_71 = arith.constant 0 : index
    %c0_72 = arith.constant 0 : index
    %82 = vector.load %arg8[%c0_71, %c0_72] : memref<16x16xf32, #tpu.memory_space<vmem>>, vector<16x16xf32>
    %cst_73 = arith.constant dense<0.000000e+00> : vector<2x16xf32>
    %83 = tpu.matmul %81, %82, %cst_73 {dimension_numbers = #tpu.dot_dimension_numbers<[1], [0], [0], [1], [0, 0, 1, 1], [], []>} : vector<2x16xf32>, vector<16x16xf32>, vector<2x16xf32> -> vector<2x16xf32>
    %c0_74 = arith.constant 0 : index
    %c0_75 = arith.constant 0 : index
    %84 = vector.load %arg9[%c0_74, %c0_75] : memref<1x16xf32, #tpu.memory_space<vmem>>, vector<1x16xf32>
    %85 = vector.broadcast %84 : vector<1x16xf32> to vector<2x16xf32>
    %86 = arith.addf %83, %85 : vector<2x16xf32>
    %cst_76 = arith.constant 0.000000e+00 : f32
    %87 = vector.broadcast %cst_76 : f32 to vector<2x16xf32>
    %88 = arith.maximumf %86, %87 : vector<2x16xf32>
    %c0_77 = arith.constant 0 : index
    %c32 = arith.constant 32 : index
    %89 = vector.load %arg10[%c0_77, %c32] : memref<2x128xf32, #tpu.memory_space<vmem>>, vector<2x16xf32>
    tpu.vector_store %arg10[%c0_77, %c32], %88 {strides = array<i32>} : memref<2x128xf32, #tpu.memory_space<vmem>>, vector<2x16xf32>,
    %c0_78 = arith.constant 0 : index
    %c768 = arith.constant 768 : index
    %90 = vector.load %arg1[%c0_78, %c768] : memref<2x2048xf32, #tpu.memory_space<vmem>>, vector<2x256xf32>
    %c0_79 = arith.constant 0 : index
    %c0_80 = arith.constant 0 : index
    %91 = vector.load %arg2[%c0_79, %c0_80] : memref<256x16xf32, #tpu.memory_space<vmem>>, vector<256x16xf32>
    %cst_81 = arith.constant dense<0.000000e+00> : vector<2x16xf32>
    %92 = tpu.matmul %90, %91, %cst_81 {dimension_numbers = #tpu.dot_dimension_numbers<[1], [0], [0], [1], [0, 0, 1, 1], [], []>} : vector<2x256xf32>, vector<256x16xf32>, vector<2x16xf32> -> vector<2x16xf32>
    %c0_82 = arith.constant 0 : index
    %c0_83 = arith.constant 0 : index
    %93 = vector.load %arg3[%c0_82, %c0_83] : memref<1x16xf32, #tpu.memory_space<vmem>>, vector<1x16xf32>
    %94 = vector.broadcast %93 : vector<1x16xf32> to vector<2x16xf32>
    %95 = arith.addf %92, %94 : vector<2x16xf32>
    %cst_84 = arith.constant 0.000000e+00 : f32
    %96 = vector.broadcast %cst_84 : f32 to vector<2x16xf32>
    %97 = arith.maximumf %95, %96 : vector<2x16xf32>
    %c0_85 = arith.constant 0 : index
    %c0_86 = arith.constant 0 : index
    %98 = vector.load %arg4[%c0_85, %c0_86] : memref<16x16xf32, #tpu.memory_space<vmem>>, vector<16x16xf32>
    %cst_87 = arith.constant dense<0.000000e+00> : vector<2x16xf32>
    %99 = tpu.matmul %97, %98, %cst_87 {dimension_numbers = #tpu.dot_dimension_numbers<[1], [0], [0], [1], [0, 0, 1, 1], [], []>} : vector<2x16xf32>, vector<16x16xf32>, vector<2x16xf32> -> vector<2x16xf32>
    %c0_88 = arith.constant 0 : index
    %c0_89 = arith.constant 0 : index
    %100 = vector.load %arg5[%c0_88, %c0_89] : memref<1x16xf32, #tpu.memory_space<vmem>>, vector<1x16xf32>
    %101 = vector.broadcast %100 : vector<1x16xf32> to vector<2x16xf32>
    %102 = arith.addf %99, %101 : vector<2x16xf32>
    %cst_90 = arith.constant 0.000000e+00 : f32
    %103 = vector.broadcast %cst_90 : f32 to vector<2x16xf32>
    %104 = arith.maximumf %102, %103 : vector<2x16xf32>
    %c0_91 = arith.constant 0 : index
    %c0_92 = arith.constant 0 : index
    %105 = vector.load %arg6[%c0_91, %c0_92] : memref<16x16xf32, #tpu.memory_space<vmem>>, vector<16x16xf32>
    %cst_93 = arith.constant dense<0.000000e+00> : vector<2x16xf32>
    %106 = tpu.matmul %104, %105, %cst_93 {dimension_numbers = #tpu.dot_dimension_numbers<[1], [0], [0], [1], [0, 0, 1, 1], [], []>} : vector<2x16xf32>, vector<16x16xf32>, vector<2x16xf32> -> vector<2x16xf32>
    %c0_94 = arith.constant 0 : index
    %c0_95 = arith.constant 0 : index
    %107 = vector.load %arg7[%c0_94, %c0_95] : memref<1x16xf32, #tpu.memory_space<vmem>>, vector<1x16xf32>
    %108 = vector.broadcast %107 : vector<1x16xf32> to vector<2x16xf32>
    %109 = arith.addf %106, %108 : vector<2x16xf32>
    %cst_96 = arith.constant 0.000000e+00 : f32
    %110 = vector.broadcast %cst_96 : f32 to vector<2x16xf32>
    %111 = arith.maximumf %109, %110 : vector<2x16xf32>
    %c0_97 = arith.constant 0 : index
    %c0_98 = arith.constant 0 : index
    %112 = vector.load %arg8[%c0_97, %c0_98] : memref<16x16xf32, #tpu.memory_space<vmem>>, vector<16x16xf32>
    %cst_99 = arith.constant dense<0.000000e+00> : vector<2x16xf32>
    %113 = tpu.matmul %111, %112, %cst_99 {dimension_numbers = #tpu.dot_dimension_numbers<[1], [0], [0], [1], [0, 0, 1, 1], [], []>} : vector<2x16xf32>, vector<16x16xf32>, vector<2x16xf32> -> vector<2x16xf32>
    %c0_100 = arith.constant 0 : index
    %c0_101 = arith.constant 0 : index
    %114 = vector.load %arg9[%c0_100, %c0_101] : memref<1x16xf32, #tpu.memory_space<vmem>>, vector<1x16xf32>
    %115 = vector.broadcast %114 : vector<1x16xf32> to vector<2x16xf32>
    %116 = arith.addf %113, %115 : vector<2x16xf32>
    %cst_102 = arith.constant 0.000000e+00 : f32
    %117 = vector.broadcast %cst_102 : f32 to vector<2x16xf32>
    %118 = arith.maximumf %116, %117 : vector<2x16xf32>
    %c0_103 = arith.constant 0 : index
    %c48 = arith.constant 48 : index
    %119 = vector.load %arg10[%c0_103, %c48] : memref<2x128xf32, #tpu.memory_space<vmem>>, vector<2x16xf32>
    tpu.vector_store %arg10[%c0_103, %c48], %118 {strides = array<i32>} : memref<2x128xf32, #tpu.memory_space<vmem>>, vector<2x16xf32>,
    %c0_104 = arith.constant 0 : index
    %c1024 = arith.constant 1024 : index
    %120 = vector.load %arg1[%c0_104, %c1024] : memref<2x2048xf32, #tpu.memory_space<vmem>>, vector<2x256xf32>
    %c0_105 = arith.constant 0 : index
    %c0_106 = arith.constant 0 : index
    %121 = vector.load %arg2[%c0_105, %c0_106] : memref<256x16xf32, #tpu.memory_space<vmem>>, vector<256x16xf32>
    %cst_107 = arith.constant dense<0.000000e+00> : vector<2x16xf32>
    %122 = tpu.matmul %120, %121, %cst_107 {dimension_numbers = #tpu.dot_dimension_numbers<[1], [0], [0], [1], [0, 0, 1, 1], [], []>} : vector<2x256xf32>, vector<256x16xf32>, vector<2x16xf32> -> vector<2x16xf32>
    %c0_108 = arith.constant 0 : index
    %c0_109 = arith.constant 0 : index
    %123 = vector.load %arg3[%c0_108, %c0_109] : memref<1x16xf32, #tpu.memory_space<vmem>>, vector<1x16xf32>
    %124 = vector.broadcast %123 : vector<1x16xf32> to vector<2x16xf32>
    %125 = arith.addf %122, %124 : vector<2x16xf32>
    %cst_110 = arith.constant 0.000000e+00 : f32
    %126 = vector.broadcast %cst_110 : f32 to vector<2x16xf32>
    %127 = arith.maximumf %125, %126 : vector<2x16xf32>
    %c0_111 = arith.constant 0 : index
    %c0_112 = arith.constant 0 : index
    %128 = vector.load %arg4[%c0_111, %c0_112] : memref<16x16xf32, #tpu.memory_space<vmem>>, vector<16x16xf32>
    %cst_113 = arith.constant dense<0.000000e+00> : vector<2x16xf32>
    %129 = tpu.matmul %127, %128, %cst_113 {dimension_numbers = #tpu.dot_dimension_numbers<[1], [0], [0], [1], [0, 0, 1, 1], [], []>} : vector<2x16xf32>, vector<16x16xf32>, vector<2x16xf32> -> vector<2x16xf32>
    %c0_114 = arith.constant 0 : index
    %c0_115 = arith.constant 0 : index
    %130 = vector.load %arg5[%c0_114, %c0_115] : memref<1x16xf32, #tpu.memory_space<vmem>>, vector<1x16xf32>
    %131 = vector.broadcast %130 : vector<1x16xf32> to vector<2x16xf32>
    %132 = arith.addf %129, %131 : vector<2x16xf32>
    %cst_116 = arith.constant 0.000000e+00 : f32
    %133 = vector.broadcast %cst_116 : f32 to vector<2x16xf32>
    %134 = arith.maximumf %132, %133 : vector<2x16xf32>
    %c0_117 = arith.constant 0 : index
    %c0_118 = arith.constant 0 : index
    %135 = vector.load %arg6[%c0_117, %c0_118] : memref<16x16xf32, #tpu.memory_space<vmem>>, vector<16x16xf32>
    %cst_119 = arith.constant dense<0.000000e+00> : vector<2x16xf32>
    %136 = tpu.matmul %134, %135, %cst_119 {dimension_numbers = #tpu.dot_dimension_numbers<[1], [0], [0], [1], [0, 0, 1, 1], [], []>} : vector<2x16xf32>, vector<16x16xf32>, vector<2x16xf32> -> vector<2x16xf32>
    %c0_120 = arith.constant 0 : index
    %c0_121 = arith.constant 0 : index
    %137 = vector.load %arg7[%c0_120, %c0_121] : memref<1x16xf32, #tpu.memory_space<vmem>>, vector<1x16xf32>
    %138 = vector.broadcast %137 : vector<1x16xf32> to vector<2x16xf32>
    %139 = arith.addf %136, %138 : vector<2x16xf32>
    %cst_122 = arith.constant 0.000000e+00 : f32
    %140 = vector.broadcast %cst_122 : f32 to vector<2x16xf32>
    %141 = arith.maximumf %139, %140 : vector<2x16xf32>
    %c0_123 = arith.constant 0 : index
    %c0_124 = arith.constant 0 : index
    %142 = vector.load %arg8[%c0_123, %c0_124] : memref<16x16xf32, #tpu.memory_space<vmem>>, vector<16x16xf32>
    %cst_125 = arith.constant dense<0.000000e+00> : vector<2x16xf32>
    %143 = tpu.matmul %141, %142, %cst_125 {dimension_numbers = #tpu.dot_dimension_numbers<[1], [0], [0], [1], [0, 0, 1, 1], [], []>} : vector<2x16xf32>, vector<16x16xf32>, vector<2x16xf32> -> vector<2x16xf32>
    %c0_126 = arith.constant 0 : index
    %c0_127 = arith.constant 0 : index
    %144 = vector.load %arg9[%c0_126, %c0_127] : memref<1x16xf32, #tpu.memory_space<vmem>>, vector<1x16xf32>
    %145 = vector.broadcast %144 : vector<1x16xf32> to vector<2x16xf32>
    %146 = arith.addf %143, %145 : vector<2x16xf32>
    %cst_128 = arith.constant 0.000000e+00 : f32
    %147 = vector.broadcast %cst_128 : f32 to vector<2x16xf32>
    %148 = arith.maximumf %146, %147 : vector<2x16xf32>
    %c0_129 = arith.constant 0 : index
    %c64 = arith.constant 64 : index
    %149 = vector.load %arg10[%c0_129, %c64] : memref<2x128xf32, #tpu.memory_space<vmem>>, vector<2x16xf32>
    tpu.vector_store %arg10[%c0_129, %c64], %148 {strides = array<i32>} : memref<2x128xf32, #tpu.memory_space<vmem>>, vector<2x16xf32>,
    %c0_130 = arith.constant 0 : index
    %c1280 = arith.constant 1280 : index
    %150 = vector.load %arg1[%c0_130, %c1280] : memref<2x2048xf32, #tpu.memory_space<vmem>>, vector<2x256xf32>
    %c0_131 = arith.constant 0 : index
    %c0_132 = arith.constant 0 : index
    %151 = vector.load %arg2[%c0_131, %c0_132] : memref<256x16xf32, #tpu.memory_space<vmem>>, vector<256x16xf32>
    %cst_133 = arith.constant dense<0.000000e+00> : vector<2x16xf32>
    %152 = tpu.matmul %150, %151, %cst_133 {dimension_numbers = #tpu.dot_dimension_numbers<[1], [0], [0], [1], [0, 0, 1, 1], [], []>} : vector<2x256xf32>, vector<256x16xf32>, vector<2x16xf32> -> vector<2x16xf32>
    %c0_134 = arith.constant 0 : index
    %c0_135 = arith.constant 0 : index
    %153 = vector.load %arg3[%c0_134, %c0_135] : memref<1x16xf32, #tpu.memory_space<vmem>>, vector<1x16xf32>
    %154 = vector.broadcast %153 : vector<1x16xf32> to vector<2x16xf32>
    %155 = arith.addf %152, %154 : vector<2x16xf32>
    %cst_136 = arith.constant 0.000000e+00 : f32
    %156 = vector.broadcast %cst_136 : f32 to vector<2x16xf32>
    %157 = arith.maximumf %155, %156 : vector<2x16xf32>
    %c0_137 = arith.constant 0 : index
    %c0_138 = arith.constant 0 : index
    %158 = vector.load %arg4[%c0_137, %c0_138] : memref<16x16xf32, #tpu.memory_space<vmem>>, vector<16x16xf32>
    %cst_139 = arith.constant dense<0.000000e+00> : vector<2x16xf32>
    %159 = tpu.matmul %157, %158, %cst_139 {dimension_numbers = #tpu.dot_dimension_numbers<[1], [0], [0], [1], [0, 0, 1, 1], [], []>} : vector<2x16xf32>, vector<16x16xf32>, vector<2x16xf32> -> vector<2x16xf32>
    %c0_140 = arith.constant 0 : index
    %c0_141 = arith.constant 0 : index
    %160 = vector.load %arg5[%c0_140, %c0_141] : memref<1x16xf32, #tpu.memory_space<vmem>>, vector<1x16xf32>
    %161 = vector.broadcast %160 : vector<1x16xf32> to vector<2x16xf32>
    %162 = arith.addf %159, %161 : vector<2x16xf32>
    %cst_142 = arith.constant 0.000000e+00 : f32
    %163 = vector.broadcast %cst_142 : f32 to vector<2x16xf32>
    %164 = arith.maximumf %162, %163 : vector<2x16xf32>
    %c0_143 = arith.constant 0 : index
    %c0_144 = arith.constant 0 : index
    %165 = vector.load %arg6[%c0_143, %c0_144] : memref<16x16xf32, #tpu.memory_space<vmem>>, vector<16x16xf32>
    %cst_145 = arith.constant dense<0.000000e+00> : vector<2x16xf32>
    %166 = tpu.matmul %164, %165, %cst_145 {dimension_numbers = #tpu.dot_dimension_numbers<[1], [0], [0], [1], [0, 0, 1, 1], [], []>} : vector<2x16xf32>, vector<16x16xf32>, vector<2x16xf32> -> vector<2x16xf32>
    %c0_146 = arith.constant 0 : index
    %c0_147 = arith.constant 0 : index
    %167 = vector.load %arg7[%c0_146, %c0_147] : memref<1x16xf32, #tpu.memory_space<vmem>>, vector<1x16xf32>
    %168 = vector.broadcast %167 : vector<1x16xf32> to vector<2x16xf32>
    %169 = arith.addf %166, %168 : vector<2x16xf32>
    %cst_148 = arith.constant 0.000000e+00 : f32
    %170 = vector.broadcast %cst_148 : f32 to vector<2x16xf32>
    %171 = arith.maximumf %169, %170 : vector<2x16xf32>
    %c0_149 = arith.constant 0 : index
    %c0_150 = arith.constant 0 : index
    %172 = vector.load %arg8[%c0_149, %c0_150] : memref<16x16xf32, #tpu.memory_space<vmem>>, vector<16x16xf32>
    %cst_151 = arith.constant dense<0.000000e+00> : vector<2x16xf32>
    %173 = tpu.matmul %171, %172, %cst_151 {dimension_numbers = #tpu.dot_dimension_numbers<[1], [0], [0], [1], [0, 0, 1, 1], [], []>} : vector<2x16xf32>, vector<16x16xf32>, vector<2x16xf32> -> vector<2x16xf32>
    %c0_152 = arith.constant 0 : index
    %c0_153 = arith.constant 0 : index
    %174 = vector.load %arg9[%c0_152, %c0_153] : memref<1x16xf32, #tpu.memory_space<vmem>>, vector<1x16xf32>
    %175 = vector.broadcast %174 : vector<1x16xf32> to vector<2x16xf32>
    %176 = arith.addf %173, %175 : vector<2x16xf32>
    %cst_154 = arith.constant 0.000000e+00 : f32
    %177 = vector.broadcast %cst_154 : f32 to vector<2x16xf32>
    %178 = arith.maximumf %176, %177 : vector<2x16xf32>
    %c0_155 = arith.constant 0 : index
    %c80 = arith.constant 80 : index
    %179 = vector.load %arg10[%c0_155, %c80] : memref<2x128xf32, #tpu.memory_space<vmem>>, vector<2x16xf32>
    tpu.vector_store %arg10[%c0_155, %c80], %178 {strides = array<i32>} : memref<2x128xf32, #tpu.memory_space<vmem>>, vector<2x16xf32>,
    %c0_156 = arith.constant 0 : index
    %c1536 = arith.constant 1536 : index
    %180 = vector.load %arg1[%c0_156, %c1536] : memref<2x2048xf32, #tpu.memory_space<vmem>>, vector<2x256xf32>
    %c0_157 = arith.constant 0 : index
    %c0_158 = arith.constant 0 : index
    %181 = vector.load %arg2[%c0_157, %c0_158] : memref<256x16xf32, #tpu.memory_space<vmem>>, vector<256x16xf32>
    %cst_159 = arith.constant dense<0.000000e+00> : vector<2x16xf32>
    %182 = tpu.matmul %180, %181, %cst_159 {dimension_numbers = #tpu.dot_dimension_numbers<[1], [0], [0], [1], [0, 0, 1, 1], [], []>} : vector<2x256xf32>, vector<256x16xf32>, vector<2x16xf32> -> vector<2x16xf32>
    %c0_160 = arith.constant 0 : index
    %c0_161 = arith.constant 0 : index
    %183 = vector.load %arg3[%c0_160, %c0_161] : memref<1x16xf32, #tpu.memory_space<vmem>>, vector<1x16xf32>
    %184 = vector.broadcast %183 : vector<1x16xf32> to vector<2x16xf32>
    %185 = arith.addf %182, %184 : vector<2x16xf32>
    %cst_162 = arith.constant 0.000000e+00 : f32
    %186 = vector.broadcast %cst_162 : f32 to vector<2x16xf32>
    %187 = arith.maximumf %185, %186 : vector<2x16xf32>
    %c0_163 = arith.constant 0 : index
    %c0_164 = arith.constant 0 : index
    %188 = vector.load %arg4[%c0_163, %c0_164] : memref<16x16xf32, #tpu.memory_space<vmem>>, vector<16x16xf32>
    %cst_165 = arith.constant dense<0.000000e+00> : vector<2x16xf32>
    %189 = tpu.matmul %187, %188, %cst_165 {dimension_numbers = #tpu.dot_dimension_numbers<[1], [0], [0], [1], [0, 0, 1, 1], [], []>} : vector<2x16xf32>, vector<16x16xf32>, vector<2x16xf32> -> vector<2x16xf32>
    %c0_166 = arith.constant 0 : index
    %c0_167 = arith.constant 0 : index
    %190 = vector.load %arg5[%c0_166, %c0_167] : memref<1x16xf32, #tpu.memory_space<vmem>>, vector<1x16xf32>
    %191 = vector.broadcast %190 : vector<1x16xf32> to vector<2x16xf32>
    %192 = arith.addf %189, %191 : vector<2x16xf32>
    %cst_168 = arith.constant 0.000000e+00 : f32
    %193 = vector.broadcast %cst_168 : f32 to vector<2x16xf32>
    %194 = arith.maximumf %192, %193 : vector<2x16xf32>
    %c0_169 = arith.constant 0 : index
    %c0_170 = arith.constant 0 : index
    %195 = vector.load %arg6[%c0_169, %c0_170] : memref<16x16xf32, #tpu.memory_space<vmem>>, vector<16x16xf32>
    %cst_171 = arith.constant dense<0.000000e+00> : vector<2x16xf32>
    %196 = tpu.matmul %194, %195, %cst_171 {dimension_numbers = #tpu.dot_dimension_numbers<[1], [0], [0], [1], [0, 0, 1, 1], [], []>} : vector<2x16xf32>, vector<16x16xf32>, vector<2x16xf32> -> vector<2x16xf32>
    %c0_172 = arith.constant 0 : index
    %c0_173 = arith.constant 0 : index
    %197 = vector.load %arg7[%c0_172, %c0_173] : memref<1x16xf32, #tpu.memory_space<vmem>>, vector<1x16xf32>
    %198 = vector.broadcast %197 : vector<1x16xf32> to vector<2x16xf32>
    %199 = arith.addf %196, %198 : vector<2x16xf32>
    %cst_174 = arith.constant 0.000000e+00 : f32
    %200 = vector.broadcast %cst_174 : f32 to vector<2x16xf32>
    %201 = arith.maximumf %199, %200 : vector<2x16xf32>
    %c0_175 = arith.constant 0 : index
    %c0_176 = arith.constant 0 : index
    %202 = vector.load %arg8[%c0_175, %c0_176] : memref<16x16xf32, #tpu.memory_space<vmem>>, vector<16x16xf32>
    %cst_177 = arith.constant dense<0.000000e+00> : vector<2x16xf32>
    %203 = tpu.matmul %201, %202, %cst_177 {dimension_numbers = #tpu.dot_dimension_numbers<[1], [0], [0], [1], [0, 0, 1, 1], [], []>} : vector<2x16xf32>, vector<16x16xf32>, vector<2x16xf32> -> vector<2x16xf32>
    %c0_178 = arith.constant 0 : index
    %c0_179 = arith.constant 0 : index
    %204 = vector.load %arg9[%c0_178, %c0_179] : memref<1x16xf32, #tpu.memory_space<vmem>>, vector<1x16xf32>
    %205 = vector.broadcast %204 : vector<1x16xf32> to vector<2x16xf32>
    %206 = arith.addf %203, %205 : vector<2x16xf32>
    %cst_180 = arith.constant 0.000000e+00 : f32
    %207 = vector.broadcast %cst_180 : f32 to vector<2x16xf32>
    %208 = arith.maximumf %206, %207 : vector<2x16xf32>
    %c0_181 = arith.constant 0 : index
    %c96 = arith.constant 96 : index
    %209 = vector.load %arg10[%c0_181, %c96] : memref<2x128xf32, #tpu.memory_space<vmem>>, vector<2x16xf32>
    tpu.vector_store %arg10[%c0_181, %c96], %208 {strides = array<i32>} : memref<2x128xf32, #tpu.memory_space<vmem>>, vector<2x16xf32>,
    %c0_182 = arith.constant 0 : index
    %c1792 = arith.constant 1792 : index
    %210 = vector.load %arg1[%c0_182, %c1792] : memref<2x2048xf32, #tpu.memory_space<vmem>>, vector<2x256xf32>
    %c0_183 = arith.constant 0 : index
    %c0_184 = arith.constant 0 : index
    %211 = vector.load %arg2[%c0_183, %c0_184] : memref<256x16xf32, #tpu.memory_space<vmem>>, vector<256x16xf32>
    %cst_185 = arith.constant dense<0.000000e+00> : vector<2x16xf32>
    %212 = tpu.matmul %210, %211, %cst_185 {dimension_numbers = #tpu.dot_dimension_numbers<[1], [0], [0], [1], [0, 0, 1, 1], [], []>} : vector<2x256xf32>, vector<256x16xf32>, vector<2x16xf32> -> vector<2x16xf32>
    %c0_186 = arith.constant 0 : index
    %c0_187 = arith.constant 0 : index
    %213 = vector.load %arg3[%c0_186, %c0_187] : memref<1x16xf32, #tpu.memory_space<vmem>>, vector<1x16xf32>
    %214 = vector.broadcast %213 : vector<1x16xf32> to vector<2x16xf32>
    %215 = arith.addf %212, %214 : vector<2x16xf32>
    %cst_188 = arith.constant 0.000000e+00 : f32
    %216 = vector.broadcast %cst_188 : f32 to vector<2x16xf32>
    %217 = arith.maximumf %215, %216 : vector<2x16xf32>
    %c0_189 = arith.constant 0 : index
    %c0_190 = arith.constant 0 : index
    %218 = vector.load %arg4[%c0_189, %c0_190] : memref<16x16xf32, #tpu.memory_space<vmem>>, vector<16x16xf32>
    %cst_191 = arith.constant dense<0.000000e+00> : vector<2x16xf32>
    %219 = tpu.matmul %217, %218, %cst_191 {dimension_numbers = #tpu.dot_dimension_numbers<[1], [0], [0], [1], [0, 0, 1, 1], [], []>} : vector<2x16xf32>, vector<16x16xf32>, vector<2x16xf32> -> vector<2x16xf32>
    %c0_192 = arith.constant 0 : index
    %c0_193 = arith.constant 0 : index
    %220 = vector.load %arg5[%c0_192, %c0_193] : memref<1x16xf32, #tpu.memory_space<vmem>>, vector<1x16xf32>
    %221 = vector.broadcast %220 : vector<1x16xf32> to vector<2x16xf32>
    %222 = arith.addf %219, %221 : vector<2x16xf32>
    %cst_194 = arith.constant 0.000000e+00 : f32
    %223 = vector.broadcast %cst_194 : f32 to vector<2x16xf32>
    %224 = arith.maximumf %222, %223 : vector<2x16xf32>
    %c0_195 = arith.constant 0 : index
    %c0_196 = arith.constant 0 : index
    %225 = vector.load %arg6[%c0_195, %c0_196] : memref<16x16xf32, #tpu.memory_space<vmem>>, vector<16x16xf32>
    %cst_197 = arith.constant dense<0.000000e+00> : vector<2x16xf32>
    %226 = tpu.matmul %224, %225, %cst_197 {dimension_numbers = #tpu.dot_dimension_numbers<[1], [0], [0], [1], [0, 0, 1, 1], [], []>} : vector<2x16xf32>, vector<16x16xf32>, vector<2x16xf32> -> vector<2x16xf32>
    %c0_198 = arith.constant 0 : index
    %c0_199 = arith.constant 0 : index
    %227 = vector.load %arg7[%c0_198, %c0_199] : memref<1x16xf32, #tpu.memory_space<vmem>>, vector<1x16xf32>
    %228 = vector.broadcast %227 : vector<1x16xf32> to vector<2x16xf32>
    %229 = arith.addf %226, %228 : vector<2x16xf32>
    %cst_200 = arith.constant 0.000000e+00 : f32
    %230 = vector.broadcast %cst_200 : f32 to vector<2x16xf32>
    %231 = arith.maximumf %229, %230 : vector<2x16xf32>
    %c0_201 = arith.constant 0 : index
    %c0_202 = arith.constant 0 : index
    %232 = vector.load %arg8[%c0_201, %c0_202] : memref<16x16xf32, #tpu.memory_space<vmem>>, vector<16x16xf32>
    %cst_203 = arith.constant dense<0.000000e+00> : vector<2x16xf32>
    %233 = tpu.matmul %231, %232, %cst_203 {dimension_numbers = #tpu.dot_dimension_numbers<[1], [0], [0], [1], [0, 0, 1, 1], [], []>} : vector<2x16xf32>, vector<16x16xf32>, vector<2x16xf32> -> vector<2x16xf32>
    %c0_204 = arith.constant 0 : index
    %c0_205 = arith.constant 0 : index
    %234 = vector.load %arg9[%c0_204, %c0_205] : memref<1x16xf32, #tpu.memory_space<vmem>>, vector<1x16xf32>
    %235 = vector.broadcast %234 : vector<1x16xf32> to vector<2x16xf32>
    %236 = arith.addf %233, %235 : vector<2x16xf32>
    %cst_206 = arith.constant 0.000000e+00 : f32
    %237 = vector.broadcast %cst_206 : f32 to vector<2x16xf32>
    %238 = arith.maximumf %236, %237 : vector<2x16xf32>
    %c0_207 = arith.constant 0 : index
    %c112 = arith.constant 112 : index
    %239 = vector.load %arg10[%c0_207, %c112] : memref<2x128xf32, #tpu.memory_space<vmem>>, vector<2x16xf32>
    tpu.vector_store %arg10[%c0_207, %c112], %238 {strides = array<i32>} : memref<2x128xf32, #tpu.memory_space<vmem>>, vector<2x16xf32>,
    return
  }
  func.func @transform_0(%arg0: i32) -> (i32, i32) {
    %c0_i32 = arith.constant 0 : i32
    %c0_i32_0 = arith.constant 0 : i32
    return %arg0, %c0_i32 : i32, i32
  }
  func.func @transform_1(%arg0: i32) -> (i32, i32) {
    %c0_i32 = arith.constant 0 : i32
    %c0_i32_0 = arith.constant 0 : i32
    %c0_i32_1 = arith.constant 0 : i32
    return %c0_i32, %c0_i32_0 : i32, i32
  }
  func.func @transform_2(%arg0: i32) -> (i32, i32) {
    %c0_i32 = arith.constant 0 : i32
    %c0_i32_0 = arith.constant 0 : i32
    %c0_i32_1 = arith.constant 0 : i32
    return %c0_i32, %c0_i32_0 : i32, i32
  }
  func.func @transform_3(%arg0: i32) -> (i32, i32) {
    %c0_i32 = arith.constant 0 : i32
    %c0_i32_0 = arith.constant 0 : i32
    %c0_i32_1 = arith.constant 0 : i32
    return %c0_i32, %c0_i32_0 : i32, i32
  }
  func.func @transform_4(%arg0: i32) -> (i32, i32) {
    %c0_i32 = arith.constant 0 : i32
    %c0_i32_0 = arith.constant 0 : i32
    %c0_i32_1 = arith.constant 0 : i32
    return %c0_i32, %c0_i32_0 : i32, i32
  }
  func.func @transform_5(%arg0: i32) -> (i32, i32) {
    %c0_i32 = arith.constant 0 : i32
    %c0_i32_0 = arith.constant 0 : i32
    %c0_i32_1 = arith.constant 0 : i32
    return %c0_i32, %c0_i32_0 : i32, i32
  }
  func.func @transform_6(%arg0: i32) -> (i32, i32) {
    %c0_i32 = arith.constant 0 : i32
    %c0_i32_0 = arith.constant 0 : i32
    %c0_i32_1 = arith.constant 0 : i32
    return %c0_i32, %c0_i32_0 : i32, i32
  }
  func.func @transform_7(%arg0: i32) -> (i32, i32) {
    %c0_i32 = arith.constant 0 : i32
    %c0_i32_0 = arith.constant 0 : i32
    %c0_i32_1 = arith.constant 0 : i32
    return %c0_i32, %c0_i32_0 : i32, i32
  }
  func.func @transform_8(%arg0: i32) -> (i32, i32) {
    %c0_i32 = arith.constant 0 : i32
    %c0_i32_0 = arith.constant 0 : i32
    %c0_i32_1 = arith.constant 0 : i32
    return %c0_i32, %c0_i32_0 : i32, i32
  }
  func.func @transform_9(%arg0: i32) -> (i32, i32) {
    %c0_i32 = arith.constant 0 : i32
    %c0_i32_0 = arith.constant 0 : i32
    return %arg0, %c0_i32 : i32, i32
  }
}

</mosaic_0001>

<bundles_post_ra>
// kernel: encoder_forward.1
= control target key start
LH: loop header
LB: loop body
LE: loop exit
PB: predicated region body
PF: predicated region fallthrough
CT: control target
= control target key end

     0   :  { %vm122_vm0 = vcmask 130048   ;;  %vm207_vm1 = vcmask 123904   ;;  %s1536_s29 = smov 16   ;;  %vm387_vm2 = vcmask 255104   ;;  %s1537_s21 = smov 32   ;;  %vm567_vm3 = vcmask 386304   ;;  %s2445_s1 = inlined_call_operand.vmem [shape: f32[256,16], index: 1, kind: input, shape index: {}]   ;;  %s2446_s0 = inlined_call_operand.vmem [shape: f32[2,2048], index: 0, kind: input, shape index: {}]   ;;  %s2447_s2 = inlined_call_operand.vmem [shape: f32[1,16], index: 2, kind: input, shape index: {}]   ;;  %s2448_s3 = inlined_call_operand.vmem [shape: f32[16,16], index: 3, kind: input, shape index: {}]   ;;  %s2449_s4 = inlined_call_operand.vmem [shape: f32[1,16], index: 4, kind: input, shape index: {}]   ;;  %s2450_s6 = inlined_call_operand.vmem [shape: f32[1,16], index: 6, kind: input, shape index: {}]   ;;  %s2451_s5 = inlined_call_operand.vmem [shape: f32[16,16], index: 5, kind: input, shape index: {}]   ;;  %s2452_s7 = inlined_call_operand.vmem [shape: f32[16,16], index: 7, kind: input, shape index: {}]   ;;  %s2453_s8 = inlined_call_operand.vmem [shape: f32[1,16], index: 8, kind: input, shape index: {}]   ;;  %s2454_s9 = inlined_call_operand.vmem [shape: f32[2,128], index: 9, kind: output, shape index: {}]  }
   0x1   :  { %v1596_v0 = vld [vmem:[%s2445_s1 + $0x78] sm:$0xff]  ;;  %v1601_v1 = vld [vmem:[%s2445_s1 + $0x70] sm:$0xff]  ;;  %v1618_v4 = vld [vmem:[%s2445_s1 + $0x68] sm:$0xff]  ;;  %s1538_s11 = smov 48   ;;  %vm747_vm4 = vcmask 517504   ;;  %s1539_s30 = smov 64  }
   0x2   :  { %v1606_v2 = vld [vmem:[%s2445_s1 + $0xf8] sm:$0xff]  ;;  %75 = vmatpush.msra.mxu0 %v1596_v0  ;;  %v1613_v3 = vld [vmem:[%s2445_s1 + $0xf0] sm:$0xff]  ;;  %v1623_v5 = vld [vmem:[%s2445_s1 + $0xe8] sm:$0xff]  ;;  %vm927_vm5 = vcmask 648704   ;;  %s1540_s25 = smov 80   ;;  %vm1107_vm6 = vcmask 779904  }
   0x3   :  { %95 = vmatpush.msra.mxu1 %v1606_v2  ;;  %v1630_v6 = vld [vmem:[%s2445_s1 + $0x60] sm:$0xff]  ;;  %v1642_v8 = vld [vmem:[%s2445_s1 + $0x58] sm:$0xff]  ;;  %v1654_v10 = vld [vmem:[%s2445_s1 + $0x50] sm:$0xff]  ;;  %s1541_s14 = smov 96   ;;  %vm1287_vm7 = vcmask 911104   ;;  %vm1467_vm8 = vcmask 1042304  }
   0x4   :  { %76 = vmatpush.msra.mxu0 %v1601_v1  ;;  %v1635_v7 = vld [vmem:[%s2445_s1 + $0xe0] sm:$0xff]  ;;  %v1647_v9 = vld [vmem:[%s2445_s1 + $0xd8] sm:$0xff]  ;;  %v1659_v11 = vld [vmem:[%s2445_s1 + $0xd0] sm:$0xff] }
   0x5   :  { %96 = vmatpush.msra.mxu1 %v1613_v3  ;;  %v1666_v12 = vld [vmem:[%s2445_s1 + $0x48] sm:$0xff]  ;;  %v32_v14 = vld [vmem:[%s2446_s0] sm:$0xf]  ;;  %v1686_v16 = vld [vmem:[%s2445_s1 + $0x38] sm:$0xff] }
   0x6   :  { %77 = vmatpush.msra.mxu0 %v1618_v4  ;;  %v1671_v13 = vld [vmem:[%s2445_s1 + $0xc8] sm:$0xff]  ;;  %v1681_v15 = vld [vmem:[%s2445_s1 + $0x40] sm:$0xff]  ;;  %70 = vst [vmem:[#allocation1] ss:$4 sm:$0xff] %v32_v14  ;;  %v1696_v18 = vld [vmem:[%s2445_s1 + $0xb8] sm:$0xff] }
   0x7   :  { %97 = vmatpush.msra.mxu1 %v1623_v5  ;;  %v1691_v17 = vld [vmem:[%s2445_s1 + $0xc0] sm:$0xff]  ;;  %v1705_v19 = vld [vmem:[%s2445_s1 + $0x30] sm:$0xff]  ;;  %v1720_v22 = vld [vmem:[%s2445_s1 + $0x28] sm:$0xff] }
   0x8   :  { %78 = vmatpush.msra.mxu0 %v1630_v6  ;;  %v1710_v20 = vld [vmem:[%s2445_s1 + $0xb0] sm:$0xff]  ;;  %v209_v21 = vld [vmem:[%s2446_s0 + $0x4] sm:$0xf]  ;;  %v1725_v23 = vld [vmem:[%s2445_s1 + $0xa8] sm:$0xff] }
   0x9   :  { %98 = vmatpush.msra.mxu1 %v1635_v7  ;;  %v1732_v26 = vld [vmem:[%s2445_s1 + $0x20] sm:$0xff]  ;;  %v1744_v28 = vld [vmem:[%s2445_s1 + $0x18] sm:$0xff]  ;;  %v1756_v30 = vld [vmem:[%s2445_s1 + $0x10] sm:$0xff] }
   0xa   :  { %79 = vmatpush.msra.mxu0 %v1642_v8  ;;  %v1737_v27 = vld [vmem:[%s2445_s1 + $0xa0] sm:$0xff]  ;;  %v1749_v29 = vld [vmem:[%s2445_s1 + $0x98] sm:$0xff]  ;;  %v1761_v31 = vld [vmem:[%s2445_s1 + $0x90] sm:$0xff] }
   0xb   :  { %99 = vmatpush.msra.mxu1 %v1647_v9  ;;  %v1768_v32 = vld [vmem:[%s2445_s1 + $0x8] sm:$0xff]  ;;  %v1780_v34 = vld [vmem:[%s2445_s1] sm:$0xff] }
   0xc   :  { %80 = vmatpush.msra.mxu0 %v1654_v10  ;;  %v1773_v33 = vld [vmem:[%s2445_s1 + $0x88] sm:$0xff]  ;;  %v1785_v35 = vld [vmem:[%s2445_s1 + $0x80] sm:$0xff] }
   0xd   :  { %100 = vmatpush.msra.mxu1 %v1659_v11  ;;  %v71_v24 = vld.sshfl [vmem:[#allocation1] sm:$0xff pattern:$0x73625140]  ;;  %v72_v25 = vld.sshfl [vmem:[#allocation1 + $0x8] sm:$0xff pattern:$0x73625140] }
   0xe   :  { %81 = vmatpush.msra.mxu0 %v1666_v12  ;;  %247 = vst [vmem:[#allocation1] ss:$4 sm:$0xff] %v209_v21  ;;  %v1792_v36 = vld [vmem:[%s2448_s3 + $0x8] sm:$0xff]  ;;  %v1801_v37 = vld [vmem:[%s2448_s3] sm:$0xff] }
   0xf   :  { %101 = vmatpush.msra.mxu1 %v1671_v13  ;;  %v1504_v38 = vld [vmem:[%s2447_s2] ss:$0 sm:$0xff]  ;;  %v1828_v44 = vld [vmem:[%s2451_s5 + $0x8] sm:$0xff] }
  0x10   :  { %82 = vmatpush.msra.mxu0 %v1681_v15  ;;  %170 = vmatpush.msra.mxu3 %v1828_v44  ;;  %v1835_v45 = vld [vmem:[%s2451_s5] sm:$0xff]  ;;  %v1842_v46 = vld [vmem:[%s2452_s7 + $0x8] sm:$0xff] }
  0x11   :  { %102 = vmatpush.msra.mxu1 %v1691_v17  ;;  %v1848_v47 = vld [vmem:[%s2452_s7] sm:$0xff]  ;;  %200 = vmatpush.msra.mxu2 %v1842_v46  ;;  %v389_v54 = vld [vmem:[%s2446_s0 + $0x8] sm:$0xf] }
  0x12   :  { %83 = vmatpush.msra.mxu0 %v1686_v16  ;;  %171 = vmatpush.msra.mxu3 %v1835_v45  ;;  %v1505_v48 = vld [vmem:[%s2449_s4] ss:$0 sm:$0xff] }
  0x13   :  { %103 = vmatpush.msra.mxu1 %v1696_v18  ;;  %201 = vmatpush.msra.mxu2 %v1848_v47  ;;  %v1506_v55 = vld [vmem:[%s2450_s6] ss:$0 sm:$0xff] }
  0x14   :  { %84 = vmatpush.msra.mxu0 %v1705_v19  ;;  %252 = vmatpush.msrb.mxu3 %v1596_v0  ;;  %v1507_v59 = vld [vmem:[%s2453_s8] ss:$0 sm:$0xff] }
  0x15   :  { %104 = vmatpush.msra.mxu1 %v1710_v20  ;;  %272 = vmatpush.msrb.mxu2 %v1606_v2  ;;  %v248_v52 = vld.sshfl [vmem:[#allocation1] sm:$0xff pattern:$0x73625140]  ;;  %v249_v53 = vld.sshfl [vmem:[#allocation1 + $0x8] sm:$0xff pattern:$0x73625140] }
  0x16   :  { %85 = vmatpush.msra.mxu0 %v1720_v22  ;;  %253 = vmatpush.msrb.mxu3 %v1601_v1  ;;  %427 = vst [vmem:[#allocation1] ss:$4 sm:$0xff] %v389_v54  ;;  %v1508_v62 = vld [vmem:[%s2447_s2] ss:$0 sm:$0xff] }
  0x17   :  { %105 = vmatpush.msra.mxu1 %v1725_v23  ;;  %273 = vmatpush.msrb.mxu2 %v1613_v3 }
  0x18   :  { %86 = vmatpush.msra.mxu0 %v1732_v26  ;;  %254 = vmatpush.msrb.mxu3 %v1618_v4 }
  0x19   :  { %106 = vmatpush.msra.mxu1 %v1737_v27  ;;  %274 = vmatpush.msrb.mxu2 %v1623_v5 }
  0x1a   :  { %87 = vmatpush.msra.mxu0 %v1744_v28  ;;  %255 = vmatpush.msrb.mxu3 %v1630_v6 }
  0x1b   :  { %107 = vmatpush.msra.mxu1 %v1749_v29  ;;  %275 = vmatpush.msrb.mxu2 %v1635_v7 }
  0x1c   :  { %88 = vmatpush.msra.mxu0 %v1756_v30  ;;  %256 = vmatpush.msrb.mxu3 %v1642_v8 }
  0x1d   :  { %108 = vmatpush.msra.mxu1 %v1761_v31  ;;  %276 = vmatpush.msrb.mxu2 %v1647_v9 }
  0x1e   :  { %89 = vmatpush.msra.mxu0 %v1768_v32  ;;  %257 = vmatpush.msrb.mxu3 %v1654_v10 }
  0x1f   :  { %109 = vmatpush.msra.mxu1 %v1773_v33  ;;  %277 = vmatpush.msrb.mxu2 %v1659_v11 }
  0x20   :  { %90 = vmatpush.msra.mxu0 %v1780_v34  ;;  %258 = vmatpush.msrb.mxu3 %v1666_v12 }
  0x21   :  { %110 = vmatpush.msra.mxu1 %v1785_v35  ;;  %91 = vmatmul.f32.vlgmr.msra.gmra.mxu0 %v71_v24 }
  0x22   :  { %111 = vmatmul.f32.vlgmr.msra.gmra.mxu1 %v72_v25  ;;  %316 = vmatpush.msrb.mxu0 %v1792_v36 }
  0x23   :  { %140 = vmatpush.msrb.mxu1 %v1792_v36  ;;  %259 = vmatpush.msrb.mxu3 %v1681_v15 }
  0x24   :  { %317 = vmatpush.msrb.mxu0 %v1801_v37  ;;  %278 = vmatpush.msrb.mxu2 %v1671_v13 }
  0x25   :  { %141 = vmatpush.msrb.mxu1 %v1801_v37  ;;  %260 = vmatpush.msrb.mxu3 %v1686_v16 }
  0x26   :  { %432 = vmatpush.msra.mxu0 %v1596_v0  ;;  %279 = vmatpush.msrb.mxu2 %v1691_v17 }
  0x27   :  { %346 = vmatpush.msra.mxu1 %v1828_v44  ;;  %261 = vmatpush.msrb.mxu3 %v1705_v19 }
  0x28   :  { %433 = vmatpush.msra.mxu0 %v1601_v1  ;;  %280 = vmatpush.msrb.mxu2 %v1696_v18 }
  0x29   :  { %347 = vmatpush.msra.mxu1 %v1835_v45  ;;  %262 = vmatpush.msrb.mxu3 %v1720_v22 }
  0x2a   :  { %434 = vmatpush.msra.mxu0 %v1618_v4  ;;  %281 = vmatpush.msrb.mxu2 %v1710_v20 }
  0x2b   :  { %263 = vmatpush.msrb.mxu3 %v1732_v26 }
  0x2c   :  { %435 = vmatpush.msra.mxu0 %v1630_v6  ;;  %282 = vmatpush.msrb.mxu2 %v1725_v23 }
  0x2d   :  { %264 = vmatpush.msrb.mxu3 %v1744_v28 }
  0x2e   :  { %436 = vmatpush.msra.mxu0 %v1642_v8  ;;  %283 = vmatpush.msrb.mxu2 %v1737_v27 }
  0x2f   :  { %265 = vmatpush.msrb.mxu3 %v1756_v30 }
  0x30   :  { %437 = vmatpush.msra.mxu0 %v1654_v10  ;;  %284 = vmatpush.msrb.mxu2 %v1749_v29 }
  0x31   :  { %266 = vmatpush.msrb.mxu3 %v1768_v32 }
  0x32   :  { %438 = vmatpush.msra.mxu0 %v1666_v12  ;;  %285 = vmatpush.msrb.mxu2 %v1761_v31 }
  0x33   :  { %267 = vmatpush.msrb.mxu3 %v1780_v34 }
  0x34   :  { %439 = vmatpush.msra.mxu0 %v1681_v15  ;;  %286 = vmatpush.msrb.mxu2 %v1773_v33 }
  0x36   :  { %440 = vmatpush.msra.mxu0 %v1686_v16  ;;  %287 = vmatpush.msrb.mxu2 %v1785_v35 }
  0x38   :  { %441 = vmatpush.msra.mxu0 %v1705_v19 }
  0x3a   :  { %442 = vmatpush.msra.mxu0 %v1720_v22 }
  0x3c   :  { %443 = vmatpush.msra.mxu0 %v1732_v26 }
  0x3e   :  { %444 = vmatpush.msra.mxu0 %v1744_v28 }
  0x40   :  { %445 = vmatpush.msra.mxu0 %v1756_v30 }
  0x42   :  { %446 = vmatpush.msra.mxu0 %v1768_v32 }
  0x44   :  { %447 = vmatpush.msra.mxu0 %v1780_v34 }
  0x9e   :  { %v92_v39 = vpop.f32.mrf.mxu0 }
  0x9f   :  { %v112_v40 = vpop.f32.mrf.mxu1  ;;  %v93_v41 = vadd.f32 %v1504_v38, %v92_v39  ;;  %v428_v39 = vld.sshfl [vmem:[#allocation1] sm:$0xff pattern:$0x73625140] }
  0xa1   :  { %v113_v42 = vadd.f32 %v112_v40, %v93_v41  ;;  %v429_v40 = vld.sshfl [vmem:[#allocation1 + $0x8] sm:$0xff pattern:$0x73625140] }
  0xa2   :  { %v569_v41 = vld [vmem:[%s2446_s0 + $0xc] sm:$0xf] }
  0xa3   :  { %v115_v43 = vmax.f32 %v113_v42, 0.0  ;;  %607 = vst [vmem:[#allocation1] ss:$4 sm:$0xff] %v569_v41  ;;  %v1509_v42 = vld [vmem:[%s2449_s4] ss:$0 sm:$0xff] }
  0xa5   :  { %1473 = vmatmul.msk.f32.vlgmr.msrb.gmra.mxu1 %vm122_vm0, %v115_v43 }
  0xa6   :  { %452 = vmatpush.msrb.mxu1 %v1606_v2 }
  0xa8   :  { %453 = vmatpush.msrb.mxu1 %v1613_v3 }
  0xaa   :  { %454 = vmatpush.msrb.mxu1 %v1623_v5 }
  0xac   :  { %455 = vmatpush.msrb.mxu1 %v1635_v7 }
  0xae   :  { %456 = vmatpush.msrb.mxu1 %v1647_v9 }
  0xb0   :  { %457 = vmatpush.msrb.mxu1 %v1659_v11 }
  0xb2   :  { %458 = vmatpush.msrb.mxu1 %v1671_v13 }
  0xb4   :  { %459 = vmatpush.msrb.mxu1 %v1691_v17 }
  0xb6   :  { %460 = vmatpush.msrb.mxu1 %v1696_v18 }
  0xb8   :  { %461 = vmatpush.msrb.mxu1 %v1710_v20 }
  0xba   :  { %462 = vmatpush.msrb.mxu1 %v1725_v23 }
  0xbc   :  { %463 = vmatpush.msrb.mxu1 %v1737_v27 }
  0xbe   :  { %464 = vmatpush.msrb.mxu1 %v1749_v29 }
  0xc0   :  { %465 = vmatpush.msrb.mxu1 %v1761_v31 }
  0xc2   :  { %466 = vmatpush.msrb.mxu1 %v1773_v33 }
  0xc4   :  { %467 = vmatpush.msrb.mxu1 %v1785_v35 }
 0x122   :  { %v143_v49 = vpop.f32.mrf.mxu1 }
 0x123   :  { %v144_v50 = vadd.f32 %v1505_v48, %v143_v49 }
 0x125   :  { %v146_v51 = vmax.f32 %v144_v50, 0.0  ;;  %v1510_v50 = vld [vmem:[%s2450_s6] ss:$0 sm:$0xff] }
 0x127   :  { %1474 = vmatmul.msk.f32.vlgmr.msra.gmra.mxu3 %vm122_vm0, %v146_v51 }
 0x128   :  { %376 = vmatpush.msra.mxu3 %v1842_v46 }
 0x12a   :  { %377 = vmatpush.msra.mxu3 %v1848_v47 }
 0x12f   :  { %268 = vmatmul.f32.vlgmr.msrb.gmra.mxu3 %v248_v52 }
 0x130   :  { %526 = vmatpush.msrb.mxu3 %v1828_v44 }
 0x132   :  { %527 = vmatpush.msrb.mxu3 %v1835_v45 }
 0x1aa   :  { %v173_v56 = vpop.f32.mrf.mxu3 }
 0x1ab   :  { %v174_v57 = vadd.f32 %v1506_v55, %v173_v56 }
 0x1ad   :  { %v176_v58 = vmax.f32 %v174_v57, 0.0 }
 0x1af   :  { %1475 = vmatmul.msk.f32.vlgmr.msra.gmra.mxu2 %vm122_vm0, %v176_v58 }
 0x1b0   :  { %496 = vmatpush.msra.mxu2 %v1792_v36 }
 0x1b2   :  { %497 = vmatpush.msra.mxu2 %v1801_v37  ;;  %v269_v63 = vpop.f32.mrf.mxu3 }
 0x1b3   :  { %v270_v21 = vadd.f32 %v1508_v62, %v269_v63 }
 0x1b7   :  { %288 = vmatmul.f32.vlgmr.msrb.gmra.mxu2 %v249_v53  ;;  %v1511_v53 = vld [vmem:[%s2447_s2] ss:$0 sm:$0xff] }
 0x1b8   :  { %556 = vmatpush.msrb.mxu2 %v1842_v46 }
 0x1ba   :  { %557 = vmatpush.msrb.mxu2 %v1848_v47 }
 0x232   :  { %v203_v60 = vpop.f32.mrf.mxu2 }
 0x233   :  { %v204_v61 = vadd.f32 %v1507_v59, %v203_v60 }
 0x235   :  { %v206_v14 = vmax.f32 %v204_v61, 0.0  ;;  %v1519_v61 = vld [vmem:[%s2447_s2] ss:$0 sm:$0xff] }
 0x237   :  { %208 = vst.msk [vmem:[%s2454_s9] sm:$0x3] %vm207_vm1, %v206_v14 }
 0x23a   :  { %v289_v24 = vpop.f32.mrf.mxu2 }
 0x23b   :  { %v290_v25 = vadd.f32 %v289_v24, %v270_v21 }
 0x23d   :  { %v292_v38 = vmax.f32 %v290_v25, 0.0  ;;  %v1520_v25 = vld [vmem:[%s2453_s8] ss:$0 sm:$0xff] }
 0x23f   :  { %1476 = vmatmul.msk.f32.vlgmr.msrb.gmra.mxu0 %vm122_vm0, %v292_v38 }
 0x240   :  { %676 = vmatpush.msrb.mxu0 %v1792_v36 }
 0x242   :  { %677 = vmatpush.msrb.mxu0 %v1801_v37 }
 0x247   :  { %448 = vmatmul.f32.vlgmr.msra.gmra.mxu0 %v428_v39 }
 0x248   :  { %736 = vmatpush.msra.mxu0 %v1842_v46 }
 0x24a   :  { %737 = vmatpush.msra.mxu0 %v1848_v47 }
 0x2bc   :  { %v319_v43 = vpop.f32.mrf.mxu0 }
 0x2bd   :  { %v320_v48 = vadd.f32 %v1509_v42, %v319_v43  ;;  %v2068_v43 = vld [vmem:[%s2445_s1 + $0x78] sm:$0xff] }
 0x2bf   :  { %v322_v49 = vmax.f32 %v320_v48, 0.0  ;;  %v2074_v48 = vld [vmem:[%s2445_s1 + $0x70] sm:$0xff] }
 0x2c1   :  { %1477 = vmatmul.msk.f32.vlgmr.msra.gmra.mxu1 %vm122_vm0, %v322_v49  ;;  %v2079_v49 = vld [vmem:[%s2445_s1 + $0x68] sm:$0xff] }
 0x2c2   :  { %706 = vmatpush.msra.mxu1 %v1828_v44 }
 0x2c4   :  { %707 = vmatpush.msra.mxu1 %v1835_v45  ;;  %v449_v54 = vpop.f32.mrf.mxu0 }
 0x2c5   :  { %v450_v56 = vadd.f32 %v1511_v53, %v449_v54  ;;  %v2101_v53 = vld [vmem:[%s2445_s1 + $0xe8] sm:$0xff]  ;;  %v2108_v54 = vld [vmem:[%s2445_s1 + $0x58] sm:$0xff] }
 0x2c9   :  { %468 = vmatmul.f32.vlgmr.msrb.gmra.mxu1 %v429_v40 }
 0x2ca   :  { %792 = vmatpush.msrb.mxu1 %v1596_v0 }
 0x2cc   :  { %793 = vmatpush.msrb.mxu1 %v1601_v1 }
 0x2ce   :  { %794 = vmatpush.msrb.mxu1 %v1618_v4 }
 0x2d0   :  { %795 = vmatpush.msrb.mxu1 %v1630_v6 }
 0x2d2   :  { %796 = vmatpush.msrb.mxu1 %v1642_v8 }
 0x2d4   :  { %797 = vmatpush.msrb.mxu1 %v1654_v10 }
 0x2d6   :  { %798 = vmatpush.msrb.mxu1 %v1666_v12 }
 0x2d8   :  { %799 = vmatpush.msrb.mxu1 %v1681_v15 }
 0x2da   :  { %800 = vmatpush.msrb.mxu1 %v1686_v16 }
 0x2dc   :  { %801 = vmatpush.msrb.mxu1 %v1705_v19 }
 0x2de   :  { %802 = vmatpush.msrb.mxu1 %v1720_v22 }
 0x2e0   :  { %803 = vmatpush.msrb.mxu1 %v1732_v26 }
 0x2e2   :  { %804 = vmatpush.msrb.mxu1 %v1744_v28 }
 0x2e4   :  { %805 = vmatpush.msrb.mxu1 %v1756_v30 }
 0x2e6   :  { %806 = vmatpush.msrb.mxu1 %v1768_v32 }
 0x2e8   :  { %807 = vmatpush.msrb.mxu1 %v1780_v34 }
 0x33e   :  { %v349_v51 = vpop.f32.mrf.mxu1 }
 0x33f   :  { %v350_v52 = vadd.f32 %v1510_v50, %v349_v51  ;;  %v2084_v50 = vld [vmem:[%s2445_s1 + $0xf8] sm:$0xff]  ;;  %v2091_v51 = vld [vmem:[%s2445_s1 + $0xf0] sm:$0xff] }
 0x341   :  { %v352_v55 = vmax.f32 %v350_v52, 0.0  ;;  %v2096_v52 = vld [vmem:[%s2445_s1 + $0x60] sm:$0xff] }
 0x343   :  { %1478 = vmatmul.msk.f32.vlgmr.msra.gmra.mxu3 %vm122_vm0, %v352_v55  ;;  %v2113_v55 = vld [vmem:[%s2445_s1 + $0xe0] sm:$0xff] }
 0x344   :  { %612 = vmatpush.msra.mxu3 %v1596_v0  ;;  %v1512_v0 = vld [vmem:[%s2453_s8] ss:$0 sm:$0xff] }
 0x346   :  { %v469_v57 = vpop.f32.mrf.mxu1  ;;  %613 = vmatpush.msra.mxu3 %v1601_v1 }
 0x347   :  { %v470_v58 = vadd.f32 %v469_v57, %v450_v56  ;;  %v2120_v56 = vld [vmem:[%s2445_s1 + $0x50] sm:$0xff]  ;;  %v2125_v57 = vld [vmem:[%s2445_s1 + $0xd8] sm:$0xff] }
 0x348   :  { %614 = vmatpush.msra.mxu3 %v1618_v4 }
 0x349   :  { %v472_v59 = vmax.f32 %v470_v58, 0.0  ;;  %v2132_v58 = vld [vmem:[%s2445_s1 + $0x48] sm:$0xff] }
 0x34a   :  { %615 = vmatpush.msra.mxu3 %v1630_v6 }
 0x34b   :  { %1479 = vmatmul.msk.f32.vlgmr.msra.gmra.mxu2 %vm122_vm0, %v472_v59  ;;  %v2137_v59 = vld [vmem:[%s2445_s1 + $0xd0] sm:$0xff] }
 0x34c   :  { %632 = vmatpush.msra.mxu2 %v1606_v2  ;;  %616 = vmatpush.msra.mxu3 %v1642_v8  ;;  %v1513_v8 = vld [vmem:[%s2449_s4] ss:$0 sm:$0xff] }
 0x34e   :  { %633 = vmatpush.msra.mxu2 %v1613_v3  ;;  %617 = vmatpush.msra.mxu3 %v1654_v10 }
 0x350   :  { %634 = vmatpush.msra.mxu2 %v1623_v5  ;;  %618 = vmatpush.msra.mxu3 %v1666_v12 }
 0x352   :  { %635 = vmatpush.msra.mxu2 %v1635_v7  ;;  %619 = vmatpush.msra.mxu3 %v1681_v15 }
 0x354   :  { %636 = vmatpush.msra.mxu2 %v1647_v9  ;;  %620 = vmatpush.msra.mxu3 %v1686_v16 }
 0x356   :  { %637 = vmatpush.msra.mxu2 %v1659_v11  ;;  %621 = vmatpush.msra.mxu3 %v1705_v19 }
 0x358   :  { %638 = vmatpush.msra.mxu2 %v1671_v13  ;;  %622 = vmatpush.msra.mxu3 %v1720_v22 }
 0x35a   :  { %639 = vmatpush.msra.mxu2 %v1691_v17  ;;  %623 = vmatpush.msra.mxu3 %v1732_v26 }
 0x35c   :  { %640 = vmatpush.msra.mxu2 %v1696_v18  ;;  %624 = vmatpush.msra.mxu3 %v1744_v28 }
 0x35e   :  { %641 = vmatpush.msra.mxu2 %v1710_v20  ;;  %625 = vmatpush.msra.mxu3 %v1756_v30 }
 0x360   :  { %642 = vmatpush.msra.mxu2 %v1725_v23  ;;  %626 = vmatpush.msra.mxu3 %v1768_v32  ;;  %v1517_v32 = vld [vmem:[%s2449_s4] ss:$0 sm:$0xff] }
 0x362   :  { %643 = vmatpush.msra.mxu2 %v1737_v27  ;;  %627 = vmatpush.msra.mxu3 %v1780_v34 }
 0x364   :  { %644 = vmatpush.msra.mxu2 %v1749_v29 }
 0x366   :  { %645 = vmatpush.msra.mxu2 %v1761_v31 }
 0x368   :  { %646 = vmatpush.msra.mxu2 %v1773_v33 }
 0x36a   :  { %647 = vmatpush.msra.mxu2 %v1785_v35 }
 0x3c6   :  { %v379_v1 = vpop.f32.mrf.mxu3 }
 0x3c7   :  { %v380_v4 = vadd.f32 %v1512_v0, %v379_v1  ;;  %v2144_v0 = vld [vmem:[%s2445_s1 + $0x40] sm:$0xff]  ;;  %v2149_v1 = vld [vmem:[%s2445_s1 + $0xc8] sm:$0xff] }
 0x3c9   :  { %v382_v6 = vmax.f32 %v380_v4, 0.0  ;;  %v2156_v4 = vld [vmem:[%s2445_s1 + $0x38] sm:$0xff] }
 0x3cb   :  { %384 = vrot.lane.b32.xlu0 %v382_v6, %s1536_s29  ;;  %v2161_v6 = vld [vmem:[%s2445_s1 + $0xc0] sm:$0xff] }
 0x3ce   :  { %v499_v10 = vpop.f32.mrf.mxu2 }
 0x3cf   :  { %v500_v12 = vadd.f32 %v1513_v8, %v499_v10  ;;  %v2168_v8 = vld [vmem:[%s2445_s1 + $0x30] sm:$0xff]  ;;  %v2173_v10 = vld [vmem:[%s2445_s1 + $0xb8] sm:$0xff] }
 0x3d1   :  { %v502_v15 = vmax.f32 %v500_v12, 0.0  ;;  %v2180_v12 = vld [vmem:[%s2445_s1 + $0x28] sm:$0xff] }
 0x3d3   :  { %1480 = vmatmul.msk.f32.vlgmr.msrb.gmra.mxu3 %vm122_vm0, %v502_v15  ;;  %v2187_v15 = vld [vmem:[%s2445_s1 + $0x20] sm:$0xff] }
 0x3d4   :  { %812 = vmatpush.msrb.mxu3 %v1606_v2  ;;  %v608_v2 = vld.sshfl [vmem:[#allocation1] sm:$0xff pattern:$0x73625140] }
 0x3d6   :  { %813 = vmatpush.msrb.mxu3 %v1613_v3 }
 0x3d8   :  { %814 = vmatpush.msrb.mxu3 %v1623_v5  ;;  %v609_v5 = vld.sshfl [vmem:[#allocation1 + $0x8] sm:$0xff pattern:$0x73625140] }
 0x3da   :  { %815 = vmatpush.msrb.mxu3 %v1635_v7  ;;  %v749_v7 = vld [vmem:[%s2446_s0 + $0x10] sm:$0xf] }
 0x3db   :  { %628 = vmatmul.f32.vlgmr.msra.gmra.mxu3 %v608_v2  ;;  %787 = vst [vmem:[#allocation1] ss:$4 sm:$0xff] %v749_v7  ;;  %v2193_v2 = vld [vmem:[%s2445_s1 + $0x18] sm:$0xff]  ;;  %v2208_v7 = vld [vmem:[%s2445_s1 + $0xb0] sm:$0xff] }
 0x3dc   :  { %816 = vmatpush.msrb.mxu3 %v1647_v9  ;;  %v1514_v9 = vld [vmem:[%s2450_s6] ss:$0 sm:$0xff] }
 0x3de   :  { %817 = vmatpush.msrb.mxu3 %v1659_v11 }
 0x3e0   :  { %818 = vmatpush.msrb.mxu3 %v1671_v13 }
 0x3e2   :  { %819 = vmatpush.msrb.mxu3 %v1691_v17  ;;  %v1515_v17 = vld [vmem:[%s2453_s8] ss:$0 sm:$0xff]  ;;  %v789_v30 = vld.sshfl [vmem:[#allocation1 + $0x8] sm:$0xff pattern:$0x73625140] }
 0x3e4   :  { %820 = vmatpush.msrb.mxu3 %v1696_v18 }
 0x3e6   :  { %821 = vmatpush.msrb.mxu3 %v1710_v20  ;;  %v1516_v20 = vld [vmem:[%s2447_s2] ss:$0 sm:$0xff] }
 0x3e8   :  { %822 = vmatpush.msrb.mxu3 %v1725_v23 }
 0x3ea   :  { %823 = vmatpush.msrb.mxu3 %v1737_v27 }
 0x3ec   :  { %824 = vmatpush.msrb.mxu3 %v1749_v29 }
 0x3ee   :  { %825 = vmatpush.msrb.mxu3 %v1761_v31 }
 0x3f0   :  { %826 = vmatpush.msrb.mxu3 %v1773_v33 }
 0x3f2   :  { %827 = vmatpush.msrb.mxu3 %v1785_v35 }
 0x3f3   :  { %828 = vmatmul.f32.vlgmr.msrb.gmra.mxu3 %v789_v30 }
 0x43d   :  { %v385_v3 = vpop.permute.xlu0 %384 }
 0x43e   :  { %388 = vst.msk [vmem:[%s2454_s9] sm:$0x3] %vm387_vm2, %v385_v3  ;;  %v929_v3 = vld [vmem:[%s2446_s0 + $0x14] sm:$0xf] }
 0x456   :  { %v529_v11 = vpop.f32.mrf.mxu3 }
 0x457   :  { %v530_v13 = vadd.f32 %v1514_v9, %v529_v11  ;;  %v2215_v9 = vld [vmem:[%s2445_s1 + $0x8] sm:$0xff] }
 0x458   :  { %v2220_v11 = vld [vmem:[%s2445_s1 + $0xa8] sm:$0xff] }
 0x459   :  { %v532_v16 = vmax.f32 %v530_v13, 0.0  ;;  %v2227_v13 = vld [vmem:[%s2445_s1] sm:$0xff] }
 0x45b   :  { %1481 = vmatmul.msk.f32.vlgmr.msrb.gmra.mxu2 %vm122_vm0, %v532_v16  ;;  %v2232_v16 = vld [vmem:[%s2445_s1 + $0xa0] sm:$0xff] }
 0x45c   :  { %886 = vmatpush.msrb.mxu2 %v1828_v44 }
 0x45e   :  { %887 = vmatpush.msrb.mxu2 %v1835_v45  ;;  %v629_v22 = vpop.f32.mrf.mxu3 }
 0x45f   :  { %v630_v26 = vadd.f32 %v1516_v20, %v629_v22  ;;  %v2242_v20 = vld [vmem:[%s2445_s1 + $0x98] sm:$0xff]  ;;  %v2247_v22 = vld [vmem:[%s2445_s1 + $0x90] sm:$0xff] }
 0x463   :  { %648 = vmatmul.f32.vlgmr.msra.gmra.mxu2 %v609_v5  ;;  %v2203_v5 = vld [vmem:[%s2445_s1 + $0x10] sm:$0xff] }
 0x464   :  { %972 = vmatpush.msra.mxu2 %v2068_v43 }
 0x466   :  { %973 = vmatpush.msra.mxu2 %v2074_v48 }
 0x468   :  { %974 = vmatpush.msra.mxu2 %v2079_v49 }
 0x46a   :  { %975 = vmatpush.msra.mxu2 %v2096_v52 }
 0x46c   :  { %976 = vmatpush.msra.mxu2 %v2108_v54 }
 0x46e   :  { %977 = vmatpush.msra.mxu2 %v2120_v56 }
 0x470   :  { %978 = vmatpush.msra.mxu2 %v2132_v58 }
 0x472   :  { %979 = vmatpush.msra.mxu2 %v2144_v0 }
 0x474   :  { %980 = vmatpush.msra.mxu2 %v2156_v4 }
 0x476   :  { %v829_v63 = vpop.f32.mrf.mxu3  ;;  %981 = vmatpush.msra.mxu2 %v2168_v8 }
 0x478   :  { %982 = vmatpush.msra.mxu2 %v2180_v12 }
 0x47a   :  { %983 = vmatpush.msra.mxu2 %v2187_v15 }
 0x47c   :  { %984 = vmatpush.msra.mxu2 %v2193_v2 }
 0x47e   :  { %985 = vmatpush.msra.mxu2 %v2203_v5 }
 0x480   :  { %986 = vmatpush.msra.mxu2 %v2215_v9 }
 0x482   :  { %987 = vmatpush.msra.mxu2 %v2227_v13 }
 0x4de   :  { %v559_v18 = vpop.f32.mrf.mxu2 }
 0x4df   :  { %v560_v19 = vadd.f32 %v1515_v17, %v559_v18  ;;  %v1109_v17 = vld [vmem:[%s2446_s0 + $0x18] sm:$0xf] }
 0x4e1   :  { %v562_v23 = vmax.f32 %v560_v19, 0.0 }
 0x4e3   :  { %564 = vrot.lane.b32.xlu0 %v562_v23, %s1537_s21 }
 0x4e6   :  { %v649_v27 = vpop.f32.mrf.mxu2 }
 0x4e7   :  { %v650_v28 = vadd.f32 %v649_v27, %v630_v26  ;;  %v2256_v26 = vld [vmem:[%s2445_s1 + $0x88] sm:$0xff]  ;;  %v2262_v27 = vld [vmem:[%s2445_s1 + $0x80] sm:$0xff] }
 0x4e9   :  { %v652_v29 = vmax.f32 %v650_v28, 0.0  ;;  %v1522_v28 = vld [vmem:[%s2450_s6] ss:$0 sm:$0xff] }
 0x4eb   :  { %1482 = vmatmul.msk.f32.vlgmr.msrb.gmra.mxu0 %vm122_vm0, %v652_v29 }
 0x4ec   :  { %856 = vmatpush.msrb.mxu0 %v1792_v36  ;;  %v788_v36 = vld.sshfl [vmem:[#allocation1] sm:$0xff pattern:$0x73625140] }
 0x4ed   :  { %967 = vst [vmem:[#allocation1] ss:$4 sm:$0xff] %v929_v3 }
 0x4ee   :  { %857 = vmatpush.msrb.mxu0 %v1801_v37  ;;  %v1518_v37 = vld [vmem:[%s2450_s6] ss:$0 sm:$0xff] }
 0x4f4   :  { %v968_v18 = vld.sshfl [vmem:[#allocation1] sm:$0xff pattern:$0x73625140]  ;;  %v969_v23 = vld.sshfl [vmem:[#allocation1 + $0x8] sm:$0xff pattern:$0x73625140] }
 0x4f5   :  { %1147 = vst [vmem:[#allocation1] ss:$4 sm:$0xff] %v1109_v17  ;;  %v1532_v17 = vld [vmem:[%s2447_s2] ss:$0 sm:$0xff] }
 0x555   :  { %v565_v31 = vpop.permute.xlu0 %564 }
 0x556   :  { %568 = vst.msk [vmem:[%s2454_s9] sm:$0x3] %vm567_vm3, %v565_v31 }
 0x568   :  { %v679_v33 = vpop.f32.mrf.mxu0 }
 0x569   :  { %v680_v34 = vadd.f32 %v1517_v32, %v679_v33  ;;  %v2273_v32 = vld [vmem:[%s2448_s3 + $0x8] sm:$0xff]  ;;  %v2280_v33 = vld [vmem:[%s2448_s3] sm:$0xff] }
 0x56b   :  { %v682_v35 = vmax.f32 %v680_v34, 0.0  ;;  %v1523_v34 = vld [vmem:[%s2453_s8] ss:$0 sm:$0xff] }
 0x56d   :  { %1483 = vmatmul.msk.f32.vlgmr.msra.gmra.mxu1 %vm122_vm0, %v682_v35 }
 0x56e   :  { %1036 = vmatpush.msra.mxu1 %v2273_v32 }
 0x570   :  { %1037 = vmatpush.msra.mxu1 %v2280_v33 }
 0x575   :  { %808 = vmatmul.f32.vlgmr.msrb.gmra.mxu1 %v788_v36 }
 0x5ea   :  { %v709_v44 = vpop.f32.mrf.mxu1 }
 0x5eb   :  { %v710_v45 = vadd.f32 %v1518_v37, %v709_v44  ;;  %v1524_v37 = vld [vmem:[%s2447_s2] ss:$0 sm:$0xff] }
 0x5ed   :  { %v712_v60 = vmax.f32 %v710_v45, 0.0 }
 0x5ef   :  { %1484 = vmatmul.msk.f32.vlgmr.msra.gmra.mxu0 %vm122_vm0, %v712_v60 }
 0x5f0   :  { %916 = vmatpush.msra.mxu0 %v1842_v46  ;;  %v1521_v46 = vld [vmem:[%s2449_s4] ss:$0 sm:$0xff] }
 0x5f2   :  { %v809_v62 = vpop.f32.mrf.mxu1  ;;  %917 = vmatpush.msra.mxu0 %v1848_v47 }
 0x5f3   :  { %v810_v14 = vadd.f32 %v1519_v61, %v809_v62 }
 0x5f5   :  { %v830_v21 = vadd.f32 %v829_v63, %v810_v14  ;;  %v2294_v14 = vld [vmem:[%s2451_s5 + $0x8] sm:$0xff] }
 0x5f6   :  { %1066 = vmatpush.msra.mxu3 %v2294_v14 }
 0x5f7   :  { %v832_v24 = vmax.f32 %v830_v21, 0.0  ;;  %v2301_v21 = vld [vmem:[%s2451_s5] sm:$0xff] }
 0x5f8   :  { %1067 = vmatpush.msra.mxu3 %v2301_v21 }
 0x5f9   :  { %1485 = vmatmul.msk.f32.vlgmr.msrb.gmra.mxu0 %vm122_vm0, %v832_v24  ;;  %v2309_v24 = vld [vmem:[%s2452_s7 + $0x8] sm:$0xff] }
 0x5fa   :  { %992 = vmatpush.msrb.mxu0 %v2084_v50  ;;  %1152 = vmatpush.msrb.mxu3 %v2068_v43 }
 0x5fb   :  { %1096 = vmatpush.msrb.mxu1 %v2309_v24 }
 0x5fc   :  { %993 = vmatpush.msrb.mxu0 %v2091_v51  ;;  %1153 = vmatpush.msrb.mxu3 %v2074_v48 }
 0x5fe   :  { %994 = vmatpush.msrb.mxu0 %v2101_v53  ;;  %1154 = vmatpush.msrb.mxu3 %v2079_v49 }
 0x600   :  { %995 = vmatpush.msrb.mxu0 %v2113_v55  ;;  %1155 = vmatpush.msrb.mxu3 %v2096_v52 }
 0x602   :  { %996 = vmatpush.msrb.mxu0 %v2125_v57  ;;  %1156 = vmatpush.msrb.mxu3 %v2108_v54 }
 0x604   :  { %997 = vmatpush.msrb.mxu0 %v2137_v59  ;;  %1157 = vmatpush.msrb.mxu3 %v2120_v56 }
 0x606   :  { %998 = vmatpush.msrb.mxu0 %v2149_v1  ;;  %1158 = vmatpush.msrb.mxu3 %v2132_v58 }
 0x608   :  { %999 = vmatpush.msrb.mxu0 %v2161_v6  ;;  %1159 = vmatpush.msrb.mxu3 %v2144_v0 }
 0x60a   :  { %1000 = vmatpush.msrb.mxu0 %v2173_v10  ;;  %1160 = vmatpush.msrb.mxu3 %v2156_v4 }
 0x60c   :  { %1001 = vmatpush.msrb.mxu0 %v2208_v7  ;;  %1161 = vmatpush.msrb.mxu3 %v2168_v8 }
 0x60e   :  { %1002 = vmatpush.msrb.mxu0 %v2220_v11  ;;  %1162 = vmatpush.msrb.mxu3 %v2180_v12 }
 0x610   :  { %1003 = vmatpush.msrb.mxu0 %v2232_v16  ;;  %1163 = vmatpush.msrb.mxu3 %v2187_v15 }
 0x612   :  { %1004 = vmatpush.msrb.mxu0 %v2242_v20  ;;  %1164 = vmatpush.msrb.mxu3 %v2193_v2 }
 0x614   :  { %1005 = vmatpush.msrb.mxu0 %v2247_v22  ;;  %1165 = vmatpush.msrb.mxu3 %v2203_v5 }
 0x616   :  { %1006 = vmatpush.msrb.mxu0 %v2256_v26  ;;  %1166 = vmatpush.msrb.mxu3 %v2215_v9 }
 0x618   :  { %1007 = vmatpush.msrb.mxu0 %v2262_v27  ;;  %1167 = vmatpush.msrb.mxu3 %v2227_v13 }
 0x66c   :  { %v739_v38 = vpop.f32.mrf.mxu0 }
 0x66d   :  { %v740_v39 = vadd.f32 %v1520_v25, %v739_v38  ;;  %v2314_v25 = vld [vmem:[%s2452_s7] sm:$0xff] }
 0x66e   :  { %1097 = vmatpush.msrb.mxu1 %v2314_v25 }
 0x66f   :  { %v742_v40 = vmax.f32 %v740_v39, 0.0  ;;  %v1525_v39 = vld [vmem:[%s2449_s4] ss:$0 sm:$0xff] }
 0x671   :  { %744 = vrot.lane.b32.xlu1 %v742_v40, %s1538_s11 }
 0x676   :  { %v859_v41 = vpop.f32.mrf.mxu0 }
 0x677   :  { %v860_v47 = vadd.f32 %v1521_v46, %v859_v41 }
 0x679   :  { %v862_v42 = vmax.f32 %v860_v47, 0.0  ;;  %v1289_v47 = vld [vmem:[%s2446_s0 + $0x1c] sm:$0xf] }
 0x67b   :  { %1486 = vmatmul.msk.f32.vlgmr.msrb.gmra.mxu2 %vm122_vm0, %v862_v42  ;;  %v1148_v42 = vld.sshfl [vmem:[#allocation1] sm:$0xff pattern:$0x73625140] }
 0x67c   :  { %1216 = vmatpush.msrb.mxu2 %v2273_v32 }
 0x67e   :  { %1217 = vmatpush.msrb.mxu2 %v2280_v33 }
 0x683   :  { %988 = vmatmul.f32.vlgmr.msra.gmra.mxu2 %v968_v18 }
 0x684   :  { %1276 = vmatpush.msra.mxu2 %v2309_v24 }
 0x686   :  { %1277 = vmatpush.msra.mxu2 %v2314_v25 }
 0x6e3   :  { %v745_v19 = vpop.permute.xlu1 %744 }
 0x6e4   :  { %748 = vst.msk [vmem:[%s2454_s9] sm:$0x3] %vm747_vm4, %v745_v19 }
 0x6fe   :  { %v889_v29 = vpop.f32.mrf.mxu2 }
 0x6ff   :  { %v890_v30 = vadd.f32 %v1522_v28, %v889_v29  ;;  %v1533_v28 = vld [vmem:[%s2449_s4] ss:$0 sm:$0xff] }
 0x701   :  { %v892_v31 = vmax.f32 %v890_v30, 0.0 }
 0x703   :  { %1487 = vmatmul.msk.f32.vlgmr.msra.gmra.mxu0 %vm122_vm0, %v892_v31 }
 0x704   :  { %1246 = vmatpush.msra.mxu0 %v2294_v14 }
 0x706   :  { %v989_v44 = vpop.f32.mrf.mxu2  ;;  %1247 = vmatpush.msra.mxu0 %v2301_v21 }
 0x707   :  { %v990_v60 = vadd.f32 %v1524_v37, %v989_v44 }
 0x70b   :  { %1008 = vmatmul.f32.vlgmr.msrb.gmra.mxu0 %v969_v23 }
 0x70c   :  { %1332 = vmatpush.msrb.mxu0 %v2068_v43  ;;  %v1149_v43 = vld.sshfl [vmem:[#allocation1 + $0x8] sm:$0xff pattern:$0x73625140] }
 0x70d   :  { %1327 = vst [vmem:[#allocation1] ss:$4 sm:$0xff] %v1289_v47 }
 0x70e   :  { %1333 = vmatpush.msrb.mxu0 %v2074_v48  ;;  %v1526_v48 = vld [vmem:[%s2450_s6] ss:$0 sm:$0xff] }
 0x710   :  { %1334 = vmatpush.msrb.mxu0 %v2079_v49 }
 0x712   :  { %1335 = vmatpush.msrb.mxu0 %v2096_v52 }
 0x714   :  { %1336 = vmatpush.msrb.mxu0 %v2108_v54 }
 0x716   :  { %1337 = vmatpush.msrb.mxu0 %v2120_v56  ;;  %v1527_v56 = vld [vmem:[%s2453_s8] ss:$0 sm:$0xff] }
 0x718   :  { %1338 = vmatpush.msrb.mxu0 %v2132_v58 }
 0x71a   :  { %1339 = vmatpush.msrb.mxu0 %v2144_v0 }
 0x71c   :  { %1340 = vmatpush.msrb.mxu0 %v2156_v4  ;;  %v1528_v4 = vld [vmem:[%s2447_s2] ss:$0 sm:$0xff] }
 0x71e   :  { %1341 = vmatpush.msrb.mxu0 %v2168_v8 }
 0x720   :  { %1342 = vmatpush.msrb.mxu0 %v2180_v12 }
 0x722   :  { %1343 = vmatpush.msrb.mxu0 %v2187_v15 }
 0x724   :  { %1344 = vmatpush.msrb.mxu0 %v2193_v2 }
 0x726   :  { %1345 = vmatpush.msrb.mxu0 %v2203_v5 }
 0x728   :  { %1346 = vmatpush.msrb.mxu0 %v2215_v9  ;;  %v1329_v9 = vld.sshfl [vmem:[#allocation1 + $0x8] sm:$0xff pattern:$0x73625140] }
 0x72a   :  { %1347 = vmatpush.msrb.mxu0 %v2227_v13 }
 0x780   :  { %v919_v35 = vpop.f32.mrf.mxu0 }
 0x781   :  { %v920_v36 = vadd.f32 %v1523_v34, %v919_v35 }
 0x783   :  { %v922_v45 = vmax.f32 %v920_v36, 0.0  ;;  %v1535_v36 = vld [vmem:[%s2453_s8] ss:$0 sm:$0xff] }
 0x785   :  { %924 = vrot.lane.b32.xlu1 %v922_v45, %s1539_s30 }
 0x788   :  { %v1009_v61 = vpop.f32.mrf.mxu0 }
 0x789   :  { %v1010_v62 = vadd.f32 %v1009_v61, %v990_v60 }
 0x78b   :  { %v1012_v63 = vmax.f32 %v1010_v62, 0.0 }
 0x78d   :  { %1488 = vmatmul.msk.f32.vlgmr.msra.gmra.mxu1 %vm122_vm0, %v1012_v63 }
 0x78e   :  { %1172 = vmatpush.msra.mxu1 %v2084_v50 }
 0x790   :  { %1173 = vmatpush.msra.mxu1 %v2091_v51 }
 0x792   :  { %1174 = vmatpush.msra.mxu1 %v2101_v53 }
 0x794   :  { %1175 = vmatpush.msra.mxu1 %v2113_v55 }
 0x796   :  { %1176 = vmatpush.msra.mxu1 %v2125_v57 }
 0x798   :  { %1177 = vmatpush.msra.mxu1 %v2137_v59 }
 0x79a   :  { %1178 = vmatpush.msra.mxu1 %v2149_v1 }
 0x79c   :  { %1179 = vmatpush.msra.mxu1 %v2161_v6 }
 0x79e   :  { %1180 = vmatpush.msra.mxu1 %v2173_v10 }
 0x7a0   :  { %1181 = vmatpush.msra.mxu1 %v2208_v7 }
 0x7a2   :  { %1182 = vmatpush.msra.mxu1 %v2220_v11 }
 0x7a4   :  { %1183 = vmatpush.msra.mxu1 %v2232_v16 }
 0x7a6   :  { %1184 = vmatpush.msra.mxu1 %v2242_v20 }
 0x7a8   :  { %1185 = vmatpush.msra.mxu1 %v2247_v22 }
 0x7aa   :  { %1186 = vmatpush.msra.mxu1 %v2256_v26 }
 0x7ac   :  { %1187 = vmatpush.msra.mxu1 %v2262_v27 }
 0x7f7   :  { %v925_v38 = vpop.permute.xlu1 %924 }
 0x7f8   :  { %928 = vst.msk [vmem:[%s2454_s9] sm:$0x3] %vm927_vm5, %v925_v38 }
 0x80a   :  { %v1039_v40 = vpop.f32.mrf.mxu1 }
 0x80b   :  { %v1040_v46 = vadd.f32 %v1525_v39, %v1039_v40 }
 0x80d   :  { %v1042_v41 = vmax.f32 %v1040_v46, 0.0 }
 0x80f   :  { %1489 = vmatmul.msk.f32.vlgmr.msra.gmra.mxu3 %vm122_vm0, %v1042_v41 }
 0x810   :  { %1396 = vmatpush.msra.mxu3 %v2273_v32  ;;  %v1534_v32 = vld [vmem:[%s2450_s6] ss:$0 sm:$0xff] }
 0x812   :  { %1397 = vmatpush.msra.mxu3 %v2280_v33 }
 0x817   :  { %1168 = vmatmul.f32.vlgmr.msrb.gmra.mxu3 %v1148_v42 }
 0x818   :  { %1456 = vmatpush.msrb.mxu3 %v2309_v24 }
 0x81a   :  { %1457 = vmatpush.msrb.mxu3 %v2314_v25 }
 0x892   :  { %v1069_v49 = vpop.f32.mrf.mxu3 }
 0x893   :  { %v1070_v52 = vadd.f32 %v1526_v48, %v1069_v49 }
 0x895   :  { %v1072_v54 = vmax.f32 %v1070_v52, 0.0 }
 0x897   :  { %1490 = vmatmul.msk.f32.vlgmr.msrb.gmra.mxu1 %vm122_vm0, %v1072_v54 }
 0x898   :  { %1426 = vmatpush.msrb.mxu1 %v2294_v14 }
 0x89a   :  { %1427 = vmatpush.msrb.mxu1 %v2301_v21  ;;  %v1169_v8 = vpop.f32.mrf.mxu3 }
 0x89b   :  { %v1170_v15 = vadd.f32 %v1528_v4, %v1169_v8 }
 0x89f   :  { %1188 = vmatmul.f32.vlgmr.msra.gmra.mxu1 %v1149_v43 }
 0x914   :  { %v1099_v58 = vpop.f32.mrf.mxu1 }
 0x915   :  { %v1100_v0 = vadd.f32 %v1527_v56, %v1099_v58 }
 0x917   :  { %v1102_v12 = vmax.f32 %v1100_v0, 0.0 }
 0x919   :  { %1104 = vrot.lane.b32.xlu2 %v1102_v12, %s1540_s25 }
 0x91c   :  { %v1189_v2 = vpop.f32.mrf.mxu1 }
 0x91d   :  { %v1190_v3 = vadd.f32 %v1189_v2, %v1170_v15 }
 0x91f   :  { %v1192_v5 = vmax.f32 %v1190_v3, 0.0 }
 0x921   :  { %1491 = vmatmul.msk.f32.vlgmr.msrb.gmra.mxu2 %vm122_vm0, %v1192_v5 }
 0x922   :  { %1352 = vmatpush.msrb.mxu2 %v2084_v50 }
 0x924   :  { %1353 = vmatpush.msrb.mxu2 %v2091_v51  ;;  %v1529_v51 = vld [vmem:[%s2449_s4] ss:$0 sm:$0xff]  ;;  %s1542_s4 = smov 112  }
 0x926   :  { %1354 = vmatpush.msrb.mxu2 %v2101_v53 }
 0x928   :  { %1355 = vmatpush.msrb.mxu2 %v2113_v55 }
 0x92a   :  { %1356 = vmatpush.msrb.mxu2 %v2125_v57 }
 0x92c   :  { %1357 = vmatpush.msrb.mxu2 %v2137_v59  ;;  %v1328_v59 = vld.sshfl [vmem:[#allocation1] sm:$0xff pattern:$0x73625140] }
 0x92e   :  { %1358 = vmatpush.msrb.mxu2 %v2149_v1  ;;  %v1530_v1 = vld [vmem:[%s2450_s6] ss:$0 sm:$0xff] }
 0x930   :  { %1359 = vmatpush.msrb.mxu2 %v2161_v6 }
 0x932   :  { %1360 = vmatpush.msrb.mxu2 %v2173_v10 }
 0x934   :  { %1361 = vmatpush.msrb.mxu2 %v2208_v7 }
 0x936   :  { %1362 = vmatpush.msrb.mxu2 %v2220_v11  ;;  %v1531_v11 = vld [vmem:[%s2453_s8] ss:$0 sm:$0xff] }
 0x938   :  { %1363 = vmatpush.msrb.mxu2 %v2232_v16 }
 0x93a   :  { %1364 = vmatpush.msrb.mxu2 %v2242_v20 }
 0x93c   :  { %1365 = vmatpush.msrb.mxu2 %v2247_v22 }
 0x93e   :  { %1366 = vmatpush.msrb.mxu2 %v2256_v26 }
 0x940   :  { %1367 = vmatpush.msrb.mxu2 %v2262_v27 }
 0x973   :  { %v1105_v50 = vpop.permute.xlu2 %1104 }
 0x974   :  { %1108 = vst.msk [vmem:[%s2454_s9] sm:$0x3] %vm1107_vm6, %v1105_v50 }
 0x9a4   :  { %v1219_v53 = vpop.f32.mrf.mxu2 }
 0x9a5   :  { %v1220_v55 = vadd.f32 %v1529_v51, %v1219_v53 }
 0x9a7   :  { %v1222_v57 = vmax.f32 %v1220_v55, 0.0 }
 0x9a9   :  { %1492 = vmatmul.msk.f32.vlgmr.msra.gmra.mxu0 %vm122_vm0, %v1222_v57 }
 0x9b1   :  { %1348 = vmatmul.f32.vlgmr.msrb.gmra.mxu0 %v1328_v59 }
 0xa26   :  { %v1249_v6 = vpop.f32.mrf.mxu0 }
 0xa27   :  { %v1250_v10 = vadd.f32 %v1530_v1, %v1249_v6 }
 0xa29   :  { %v1252_v7 = vmax.f32 %v1250_v10, 0.0 }
 0xa2b   :  { %1493 = vmatmul.msk.f32.vlgmr.msra.gmra.mxu2 %vm122_vm0, %v1252_v7 }
 0xa2e   :  { %v1349_v18 = vpop.f32.mrf.mxu0 }
 0xa2f   :  { %v1350_v20 = vadd.f32 %v1532_v17, %v1349_v18 }
 0xa33   :  { %1368 = vmatmul.f32.vlgmr.msrb.gmra.mxu2 %v1329_v9 }
 0xaae   :  { %v1279_v13 = vpop.f32.mrf.mxu2 }
 0xaaf   :  { %v1280_v16 = vadd.f32 %v1531_v11, %v1279_v13 }
 0xab1   :  { %v1282_v19 = vmax.f32 %v1280_v16, 0.0 }
 0xab3   :  { %1284 = vrot.lane.b32.xlu2 %v1282_v19, %s1541_s14 }
 0xab6   :  { %v1369_v22 = vpop.f32.mrf.mxu2 }
 0xab7   :  { %v1370_v23 = vadd.f32 %v1369_v22, %v1350_v20 }
 0xab9   :  { %v1372_v26 = vmax.f32 %v1370_v23, 0.0 }
 0xabb   :  { %1494 = vmatmul.msk.f32.vlgmr.msra.gmra.mxu3 %vm122_vm0, %v1372_v26 }
 0xb0d   :  { %v1285_v27 = vpop.permute.xlu2 %1284 }
 0xb0e   :  { %1288 = vst.msk [vmem:[%s2454_s9] sm:$0x3] %vm1287_vm7, %v1285_v27 }
 0xb3e   :  { %v1399_v29 = vpop.f32.mrf.mxu3 }
 0xb3f   :  { %v1400_v30 = vadd.f32 %v1533_v28, %v1399_v29 }
 0xb41   :  { %v1402_v31 = vmax.f32 %v1400_v30, 0.0 }
 0xb43   :  { %1495 = vmatmul.msk.f32.vlgmr.msrb.gmra.mxu1 %vm122_vm0, %v1402_v31 }
 0xbc0   :  { %v1429_v33 = vpop.f32.mrf.mxu1 }
 0xbc1   :  { %v1430_v34 = vadd.f32 %v1534_v32, %v1429_v33 }
 0xbc3   :  { %v1432_v35 = vmax.f32 %v1430_v34, 0.0 }
 0xbc5   :  { %1496 = vmatmul.msk.f32.vlgmr.msrb.gmra.mxu3 %vm122_vm0, %v1432_v35 }
 0xc48   :  { %v1459_v37 = vpop.f32.mrf.mxu3 }
 0xc49   :  { %v1460_v44 = vadd.f32 %v1535_v36, %v1459_v37 }
 0xc4b   :  { %v1462_v45 = vmax.f32 %v1460_v44, 0.0 }
 0xc4d   :  { %1464 = vrot.lane.b32.xlu0 %v1462_v45, %s1542_s4 }
 0xcbf   :  { %v1465_v60 = vpop.permute.xlu0 %1464 }
 0xcc0   :  { %1468 = vst.msk [vmem:[%s2454_s9] sm:$0x3] %vm1467_vm8, %v1465_v60 }

</bundles_post_ra>
